<compile_context>
chip_gen: v7x
topology: tpu7x:2x2x1
jax: 0.10.0
libtpu: 0.0.40
codegen_flags: <defaults>
</compile_context>

<pallas_src>
import jax
import jax.numpy as jnp
from jax.experimental import pallas as pl
from jax.experimental.pallas import tpu as pltpu

MXU_DTYPE = jnp.bfloat16  # MXU operand dtype (f32 accumulation everywhere)


def _round_up(x, m):
    return (x + m - 1) // m * m


# --------------------------------------------------------------------------
# RNN recurrence kernel: grid over time-chunks, hidden state carried in VMEM.
# --------------------------------------------------------------------------
def _rnn_chunk_kernel(x_ref, h0_ref, wih_t_ref, whh_t_ref, b_ref, lens_ref,
                      out_ref, hn_ref, h_scratch):
    c = pl.program_id(0)
    Bp, K, E = x_ref.shape
    Hp = hn_ref.shape[-1]

    @pl.when(c == 0)
    def _():
        h_scratch[...] = h0_ref[...]

    whh_t = whh_t_ref[...]              # (Hp, Hp) bf16, VMEM-resident
    lens = lens_ref[...]                # (Bp, 1)  int32
    bias = b_ref[...]                   # (1, Hp)  f32 (fused b_ih + b_hh)

    # Input projection for the whole chunk in ONE MXU matmul (no sequential
    # dependency), bias added once — both hoisted out of the recurrence loop.
    x2 = x_ref[...].reshape(Bp * K, E).astype(MXU_DTYPE)
    xw = jnp.dot(x2, wih_t_ref[...],
                 preferred_element_type=jnp.float32).reshape(Bp, K, Hp)
    xw = xw + bias                      # (Bp, K, Hp) f32

    # Sequential recurrence over the K steps of this chunk.  K is a small
    # static constant, so this Python loop is a full compile-time unroll.
    t0 = c * K
    h = h_scratch[...]                  # (Bp, Hp) f32
    for k in range(K):
        pre = xw[:, k, :] + jnp.dot(h.astype(MXU_DTYPE), whh_t,
                                    preferred_element_type=jnp.float32)
        h_new = jnp.tanh(pre)
        valid = (t0 + k) < lens                               # (Bp, 1) mask
        h = jnp.where(valid, h_new, h)                        # freeze past len
        out_ref[:, k:k + 1, :] = jnp.where(valid, h_new, 0.0)[:, None, :]
    h_scratch[...] = h

    # Final hidden state: single (Bp, Hp) store on the last chunk only.
    @pl.when(c == pl.num_programs(0) - 1)
    def _():
        hn_ref[...] = h


def rnn_forward(x_bte, lens, h0, w_ih, w_hh, b_ih, b_hh, *, chunk=8):
    """Single-layer tanh RNN, batch_first (B, T, E) -> ((B, T, H), (B, H)).

    Reproduces nn.RNN on a pack_padded_sequence: outputs zeroed and hidden
    state frozen for t >= lens[b]; h_n is the hidden state at each sequence's
    last valid step.
    """
    B, T, E = x_bte.shape
    H = w_ih.shape[0]
    Bp = _round_up(B, 8)          # full sublanes
    Hp = _round_up(H, 128)        # lane-dense hidden / outputs
    Tp = _round_up(T, chunk)
    n_chunks = Tp // chunk

    # Zero padding is inert: padded batch rows have length 0 (state frozen at
    # 0), padded hidden columns stay exactly 0 through tanh(0 + 0 + 0) = 0.
    x_p = jnp.zeros((Bp, Tp, E), jnp.float32).at[:B, :T, :].set(
        x_bte.astype(jnp.float32))
    lens_p = jnp.zeros((Bp, 1), jnp.int32).at[:B, 0].set(lens.astype(jnp.int32))
    h0_p = jnp.zeros((Bp, Hp), jnp.float32).at[:B, :H].set(h0.astype(jnp.float32))
    # Pre-transposed (and padded) weights: no `.T` inside the kernel.
    wih_t = jnp.zeros((E, Hp), MXU_DTYPE).at[:, :H].set(w_ih.T.astype(MXU_DTYPE))
    whh_t = jnp.zeros((Hp, Hp), MXU_DTYPE).at[:H, :H].set(w_hh.T.astype(MXU_DTYPE))
    bias = jnp.zeros((1, Hp), jnp.float32).at[0, :H].set(
        (b_ih + b_hh).astype(jnp.float32))

    grid_spec = pltpu.PrefetchScalarGridSpec(
        num_scalar_prefetch=0,
        grid=(n_chunks,),
        in_specs=[
            pl.BlockSpec((Bp, chunk, E), lambda c: (0, c, 0)),   # x chunk (batch-first)
            pl.BlockSpec((Bp, Hp), lambda c: (0, 0)),            # h0
            pl.BlockSpec((E, Hp), lambda c: (0, 0)),             # W_ih^T
            pl.BlockSpec((Hp, Hp), lambda c: (0, 0)),            # W_hh^T
            pl.BlockSpec((1, Hp), lambda c: (0, 0)),             # fused bias
            pl.BlockSpec((Bp, 1), lambda c: (0, 0)),             # lengths
        ],
        out_specs=[
            pl.BlockSpec((Bp, chunk, Hp), lambda c: (0, c, 0)),  # per-step outputs
            pl.BlockSpec((Bp, Hp), lambda c: (0, 0)),            # final hidden
        ],
        scratch_shapes=[pltpu.VMEM((Bp, Hp), jnp.float32)],      # carried h state
    )

    out_p, hn_p = pl.pallas_call(
        _rnn_chunk_kernel,
        out_shape=(jax.ShapeDtypeStruct((Bp, Tp, Hp), jnp.float32),
                   jax.ShapeDtypeStruct((Bp, Hp), jnp.float32)),
        grid_spec=grid_spec,
        compiler_params=pltpu.CompilerParams(
            # The recurrence is sequential in time -> "arbitrary".  (For large
            # batches one could add a leading batch-shard axis marked
            # "parallel" for megacore; not worth it at these sizes.)
            dimension_semantics=("arbitrary",)),
    )(x_p, h0_p, wih_t, whh_t, bias, lens_p)

    return out_p[:B, :T, :H], hn_p[:B, :H]


# --------------------------------------------------------------------------
# Module forward (matches RNN.forward for rnn_type='rnn'):
#   x_prem, h_n_prem = rnn_premise(premise_packed, h_0)
#   x_hypo, h_n_hypo = rnn_hypothesis(hypothesis_packed, h_n_prem)
# --------------------------------------------------------------------------
def rnn_module_forward(params, prem_emb, hypo_emb, prem_lens, hypo_lens, h_0):
    p = params["prem"]
    x_prem, h_n_prem = rnn_forward(prem_emb, prem_lens, h_0,
                                   p["w_ih"], p["w_hh"], p["b_ih"], p["b_hh"])
    q = params["hypo"]
    x_hypo, h_n_hypo = rnn_forward(hypo_emb, hypo_lens, h_n_prem,
                                   q["w_ih"], q["w_hh"], q["b_ih"], q["b_hh"])
    return x_prem, h_n_prem, x_hypo, h_n_hypo


# --------------------------------------------------------------------------
# Pure-JAX reference (same bf16-MXU / f32-accumulation numerics).
# --------------------------------------------------------------------------
def rnn_ref(x, lens, h0, wih, whh, bih, bhh):
    T = x.shape[1]
    wih_t = wih.T.astype(MXU_DTYPE)
    whh_t = whh.T.astype(MXU_DTYPE)
    bias = (bih + bhh)[None, :].astype(jnp.float32)

    def step(h, t):
        xt = x[:, t, :].astype(MXU_DTYPE)
        pre = (jnp.dot(xt, wih_t, preferred_element_type=jnp.float32) + bias
               + jnp.dot(h.astype(MXU_DTYPE), whh_t,
                         preferred_element_type=jnp.float32))
        h_new = jnp.tanh(pre)
        valid = (t < lens)[:, None]
        h = jnp.where(valid, h_new, h)
        return h, jnp.where(valid, h_new, 0.0)

    h, outs = jax.lax.scan(step, h0, jnp.arange(T))
    return jnp.transpose(outs, (1, 0, 2)), h


def rnn_module_ref(params, prem_emb, hypo_emb, prem_lens, hypo_lens, h_0):
    p, q = params["prem"], params["hypo"]
    xp, hp = rnn_ref(prem_emb, prem_lens, h_0,
                     p["w_ih"], p["w_hh"], p["b_ih"], p["b_hh"])
    xh, hh = rnn_ref(hypo_emb, hypo_lens, hp,
                     q["w_ih"], q["w_hh"], q["b_ih"], q["b_hh"])
    return xp, hp, xh, hh


# --------------------------------------------------------------------------
if __name__ == "__main__":
    E, H, B, T = 16, 32, 2, 8      # embedding_dim, hidden_size, batch, seq

    key = jax.random.PRNGKey(0)
    ks = jax.random.split(key, 10)
    k_rnn = 1.0 / jnp.sqrt(H)

    def uni(k, shape, bound):
        return jax.random.uniform(k, shape, jnp.float32, -bound, bound)

    params = {
        "prem": {
            "w_ih": uni(ks[0], (H, E), k_rnn), "w_hh": uni(ks[1], (H, H), k_rnn),
            "b_ih": uni(ks[2], (H,), k_rnn),   "b_hh": uni(ks[3], (H,), k_rnn),
        },
        "hypo": {
            "w_ih": uni(ks[4], (H, E), k_rnn), "w_hh": uni(ks[5], (H, H), k_rnn),
            "b_ih": uni(ks[6], (H,), k_rnn),   "b_hh": uni(ks[7], (H,), k_rnn),
        },
    }

    premise_lens = jnp.array([8, 5], jnp.int32)
    hypo_lens = jnp.array([6, 8], jnp.int32)

    # Embedded, padded sequences (the module consumes packed embedded
    # sequences; padding positions are zeroed here and masked in the kernel).
    t_iota = jnp.arange(T)[None, :, None]
    prem_emb = jax.random.normal(ks[8], (B, T, E), jnp.float32)
    prem_emb = jnp.where(t_iota < premise_lens[:, None, None], prem_emb, 0.0)
    hypo_emb = jax.random.normal(ks[9], (B, T, E), jnp.float32)
    hypo_emb = jnp.where(t_iota < hypo_lens[:, None, None], hypo_emb, 0.0)

    # init_states(): zero initial hidden (num_layers=1, unidirectional).
    h_0 = jnp.zeros((B, H), jnp.float32)

    fwd = jax.jit(rnn_module_forward)
    x_prem, h_n_prem, x_hypo, h_n_hypo = fwd(
        params, prem_emb, hypo_emb, premise_lens, hypo_lens, h_0)
    jax.block_until_ready((x_prem, h_n_prem, x_hypo, h_n_hypo))

    r_xp, r_hp, r_xh, r_hh = rnn_module_ref(
        params, prem_emb, hypo_emb, premise_lens, hypo_lens, h_0)

    assert x_prem.shape == (B, T, H) and x_hypo.shape == (B, T, H)
    assert h_n_prem.shape == (B, H) and h_n_hypo.shape == (B, H)
    assert jnp.allclose(x_prem, r_xp, atol=1e-3, rtol=1e-3)
    assert jnp.allclose(h_n_prem, r_hp, atol=1e-3, rtol=1e-3)
    assert jnp.allclose(x_hypo, r_xh, atol=1e-3, rtol=1e-3)
    assert jnp.allclose(h_n_hypo, r_hh, atol=1e-3, rtol=1e-3)

    print("KERNEL_OK")
</pallas_src>

<mosaic_0001>
module attributes {stable_mosaic.version = 11 : i64} {
  func.func @_rnn_chunk_kernel(%arg0: i32, %arg1: memref<8x8x16xf32, #tpu.memory_space<vmem>>, %arg2: memref<8x128xf32, #tpu.memory_space<vmem>>, %arg3: memref<16x128xbf16, #tpu.memory_space<vmem>>, %arg4: memref<128x128xbf16, #tpu.memory_space<vmem>>, %arg5: memref<1x128xf32, #tpu.memory_space<vmem>>, %arg6: memref<8x1xi32, #tpu.memory_space<vmem>>, %arg7: memref<8x8x128xf32, #tpu.memory_space<vmem>>, %arg8: memref<8x128xf32, #tpu.memory_space<vmem>>, %arg9: memref<8x128xf32, #tpu.memory_space<vmem>>) attributes {dimension_semantics = [#tpu.dimension_semantics<arbitrary>], iteration_bounds = array<i64: 1>, scalar_prefetch = 0 : i64, scratch_operands = 1 : i64, tpu.core_type = #tpu.core_type<tc>, window_params = [{transform_indices = @transform_0, window_bounds = array<i64: 8, 8, 16>}, {pipeline_mode = #tpu.pipeline_mode<synchronous>, transform_indices = @transform_1, window_bounds = array<i64: 8, 128>}, {pipeline_mode = #tpu.pipeline_mode<synchronous>, transform_indices = @transform_2, window_bounds = array<i64: 16, 128>}, {pipeline_mode = #tpu.pipeline_mode<synchronous>, transform_indices = @transform_3, window_bounds = array<i64: 128, 128>}, {pipeline_mode = #tpu.pipeline_mode<synchronous>, transform_indices = @transform_4, window_bounds = array<i64: 1, 128>}, {pipeline_mode = #tpu.pipeline_mode<synchronous>, transform_indices = @transform_5, window_bounds = array<i64: 8, 1>}, {transform_indices = @transform_6, window_bounds = array<i64: 8, 8, 128>}, {pipeline_mode = #tpu.pipeline_mode<synchronous>, transform_indices = @transform_7, window_bounds = array<i64: 8, 128>}]} {
    %c0_i32 = arith.constant 0 : i32
    %0 = arith.cmpi eq, %arg0, %c0_i32 : i32
    %1 = arith.extui %0 : i1 to i32
    %c0_i32_0 = arith.constant 0 : i32
    %2 = arith.cmpi ne, %1, %c0_i32_0 : i32
    scf.if %2 {
      %c0_51 = arith.constant 0 : index
      %c0_52 = arith.constant 0 : index
      %165 = vector.load %arg2[%c0_51, %c0_52] : memref<8x128xf32, #tpu.memory_space<vmem>>, vector<8x128xf32>
      %c0_53 = arith.constant 0 : index
      %c0_54 = arith.constant 0 : index
      %166 = vector.load %arg9[%c0_53, %c0_54] : memref<8x128xf32, #tpu.memory_space<vmem>>, vector<8x128xf32>
      tpu.vector_store %arg9[%c0_53, %c0_54], %165 {strides = array<i32>} : memref<8x128xf32, #tpu.memory_space<vmem>>, vector<8x128xf32>,
    } else {
    }
    %c0 = arith.constant 0 : index
    %c0_1 = arith.constant 0 : index
    %3 = vector.load %arg4[%c0, %c0_1] : memref<128x128xbf16, #tpu.memory_space<vmem>>, vector<128x128xbf16>
    %c0_2 = arith.constant 0 : index
    %c0_3 = arith.constant 0 : index
    %4 = vector.load %arg6[%c0_2, %c0_3] : memref<8x1xi32, #tpu.memory_space<vmem>>, vector<8x1xi32>
    %c0_4 = arith.constant 0 : index
    %c0_5 = arith.constant 0 : index
    %5 = vector.load %arg5[%c0_4, %c0_5] : memref<1x128xf32, #tpu.memory_space<vmem>>, vector<1x128xf32>
    %c0_6 = arith.constant 0 : index
    %c0_7 = arith.constant 0 : index
    %c0_8 = arith.constant 0 : index
    %6 = vector.load %arg1[%c0_6, %c0_7, %c0_8] : memref<8x8x16xf32, #tpu.memory_space<vmem>>, vector<8x8x16xf32>
    %7 = vector.shape_cast %6 : vector<8x8x16xf32> to vector<64x16xf32>
    %8 = arith.truncf %7 : vector<64x16xf32> to vector<64x16xbf16>
    %c0_9 = arith.constant 0 : index
    %c0_10 = arith.constant 0 : index
    %9 = vector.load %arg3[%c0_9, %c0_10] : memref<16x128xbf16, #tpu.memory_space<vmem>>, vector<16x128xbf16>
    %cst = arith.constant dense<0.000000e+00> : vector<64x128xf32>
    %10 = tpu.matmul %8, %9, %cst {dimension_numbers = #tpu.dot_dimension_numbers<[1], [0], [0], [1], [0, 0, 1, 1], [], []>} : vector<64x16xbf16>, vector<16x128xbf16>, vector<64x128xf32> -> vector<64x128xf32>
    %11 = vector.shape_cast %10 : vector<64x128xf32> to vector<8x8x128xf32>
    %12 = vector.shape_cast %5 : vector<1x128xf32> to vector<1x1x128xf32>
    %13 = vector.broadcast %12 : vector<1x1x128xf32> to vector<8x8x128xf32>
    %14 = arith.addf %11, %13 : vector<8x8x128xf32>
    %c8_i32 = arith.constant 8 : i32
    %15 = arith.muli %arg0, %c8_i32 : i32
    %c0_11 = arith.constant 0 : index
    %c0_12 = arith.constant 0 : index
    %16 = vector.load %arg9[%c0_11, %c0_12] : memref<8x128xf32, #tpu.memory_space<vmem>>, vector<8x128xf32>
    %17 = vector.extract_strided_slice %14 {offsets = [0, 0, 0], sizes = [8, 1, 128], strides = [1, 1, 1]} : vector<8x8x128xf32> to vector<8x1x128xf32>
    %18 = vector.shape_cast %17 : vector<8x1x128xf32> to vector<8x128xf32>
    %19 = arith.truncf %16 : vector<8x128xf32> to vector<8x128xbf16>
    %cst_13 = arith.constant dense<0.000000e+00> : vector<8x128xf32>
    %20 = tpu.matmul %19, %3, %cst_13 {dimension_numbers = #tpu.dot_dimension_numbers<[1], [0], [0], [1], [0, 0, 1, 1], [], []>} : vector<8x128xbf16>, vector<128x128xbf16>, vector<8x128xf32> -> vector<8x128xf32>
    %21 = arith.addf %18, %20 : vector<8x128xf32>
    %22 = math.tanh %21 : vector<8x128xf32>
    %c0_i32_14 = arith.constant 0 : i32
    %23 = arith.addi %15, %c0_i32_14 : i32
    %24 = vector.broadcast %23 : i32 to vector<8x1xi32>
    %25 = arith.cmpi slt, %24, %4 : vector<8x1xi32>
    %26 = vector.shape_cast %25 : vector<8x1xi1> to vector<8x1xi1>
    %27 = vector.broadcast %26 : vector<8x1xi1> to vector<8x128xi1>
    %28 = arith.select %27, %22, %16 : vector<8x128xi1>, vector<8x128xf32>
    %cst_15 = arith.constant 0.000000e+00 : f32
    %29 = vector.shape_cast %25 : vector<8x1xi1> to vector<8x1xi1>
    %30 = vector.broadcast %29 : vector<8x1xi1> to vector<8x128xi1>
    %31 = vector.broadcast %cst_15 : f32 to vector<8x128xf32>
    %32 = arith.select %30, %22, %31 : vector<8x128xi1>, vector<8x128xf32>
    %33 = vector.shape_cast %32 : vector<8x128xf32> to vector<8x1x128xf32>
    %c0_16 = arith.constant 0 : index
    %c0_17 = arith.constant 0 : index
    %c0_18 = arith.constant 0 : index
    %34 = vector.load %arg7[%c0_16, %c0_17, %c0_18] : memref<8x8x128xf32, #tpu.memory_space<vmem>>, vector<8x1x128xf32>
    tpu.vector_store %arg7[%c0_16, %c0_17, %c0_18], %33 {strides = array<i32>} : memref<8x8x128xf32, #tpu.memory_space<vmem>>, vector<8x1x128xf32>,
    %35 = vector.extract_strided_slice %14 {offsets = [0, 1, 0], sizes = [8, 1, 128], strides = [1, 1, 1]} : vector<8x8x128xf32> to vector<8x1x128xf32>
    %36 = vector.shape_cast %35 : vector<8x1x128xf32> to vector<8x128xf32>
    %37 = arith.truncf %28 : vector<8x128xf32> to vector<8x128xbf16>
    %cst_19 = arith.constant dense<0.000000e+00> : vector<8x128xf32>
    %38 = tpu.matmul %37, %3, %cst_19 {dimension_numbers = #tpu.dot_dimension_numbers<[1], [0], [0], [1], [0, 0, 1, 1], [], []>} : vector<8x128xbf16>, vector<128x128xbf16>, vector<8x128xf32> -> vector<8x128xf32>
    %39 = arith.addf %36, %38 : vector<8x128xf32>
    %40 = math.tanh %39 : vector<8x128xf32>
    %c1_i32 = arith.constant 1 : i32
    %41 = arith.addi %15, %c1_i32 : i32
    %42 = vector.broadcast %41 : i32 to vector<8x1xi32>
    %43 = arith.cmpi slt, %42, %4 : vector<8x1xi32>
    %44 = vector.shape_cast %43 : vector<8x1xi1> to vector<8x1xi1>
    %45 = vector.broadcast %44 : vector<8x1xi1> to vector<8x128xi1>
    %46 = arith.select %45, %40, %28 : vector<8x128xi1>, vector<8x128xf32>
    %cst_20 = arith.constant 0.000000e+00 : f32
    %47 = vector.shape_cast %43 : vector<8x1xi1> to vector<8x1xi1>
    %48 = vector.broadcast %47 : vector<8x1xi1> to vector<8x128xi1>
    %49 = vector.broadcast %cst_20 : f32 to vector<8x128xf32>
    %50 = arith.select %48, %40, %49 : vector<8x128xi1>, vector<8x128xf32>
    %51 = vector.shape_cast %50 : vector<8x128xf32> to vector<8x1x128xf32>
    %c0_21 = arith.constant 0 : index
    %c1 = arith.constant 1 : index
    %c0_22 = arith.constant 0 : index
    %52 = vector.load %arg7[%c0_21, %c1, %c0_22] : memref<8x8x128xf32, #tpu.memory_space<vmem>>, vector<8x1x128xf32>
    tpu.vector_store %arg7[%c0_21, %c1, %c0_22], %51 {strides = array<i32>} : memref<8x8x128xf32, #tpu.memory_space<vmem>>, vector<8x1x128xf32>,
    %53 = vector.extract_strided_slice %14 {offsets = [0, 2, 0], sizes = [8, 1, 128], strides = [1, 1, 1]} : vector<8x8x128xf32> to vector<8x1x128xf32>
    %54 = vector.shape_cast %53 : vector<8x1x128xf32> to vector<8x128xf32>
    %55 = arith.truncf %46 : vector<8x128xf32> to vector<8x128xbf16>
    %cst_23 = arith.constant dense<0.000000e+00> : vector<8x128xf32>
    %56 = tpu.matmul %55, %3, %cst_23 {dimension_numbers = #tpu.dot_dimension_numbers<[1], [0], [0], [1], [0, 0, 1, 1], [], []>} : vector<8x128xbf16>, vector<128x128xbf16>, vector<8x128xf32> -> vector<8x128xf32>
    %57 = arith.addf %54, %56 : vector<8x128xf32>
    %58 = math.tanh %57 : vector<8x128xf32>
    %c2_i32 = arith.constant 2 : i32
    %59 = arith.addi %15, %c2_i32 : i32
    %60 = vector.broadcast %59 : i32 to vector<8x1xi32>
    %61 = arith.cmpi slt, %60, %4 : vector<8x1xi32>
    %62 = vector.shape_cast %61 : vector<8x1xi1> to vector<8x1xi1>
    %63 = vector.broadcast %62 : vector<8x1xi1> to vector<8x128xi1>
    %64 = arith.select %63, %58, %46 : vector<8x128xi1>, vector<8x128xf32>
    %cst_24 = arith.constant 0.000000e+00 : f32
    %65 = vector.shape_cast %61 : vector<8x1xi1> to vector<8x1xi1>
    %66 = vector.broadcast %65 : vector<8x1xi1> to vector<8x128xi1>
    %67 = vector.broadcast %cst_24 : f32 to vector<8x128xf32>
    %68 = arith.select %66, %58, %67 : vector<8x128xi1>, vector<8x128xf32>
    %69 = vector.shape_cast %68 : vector<8x128xf32> to vector<8x1x128xf32>
    %c0_25 = arith.constant 0 : index
    %c2 = arith.constant 2 : index
    %c0_26 = arith.constant 0 : index
    %70 = vector.load %arg7[%c0_25, %c2, %c0_26] : memref<8x8x128xf32, #tpu.memory_space<vmem>>, vector<8x1x128xf32>
    tpu.vector_store %arg7[%c0_25, %c2, %c0_26], %69 {strides = array<i32>} : memref<8x8x128xf32, #tpu.memory_space<vmem>>, vector<8x1x128xf32>,
    %71 = vector.extract_strided_slice %14 {offsets = [0, 3, 0], sizes = [8, 1, 128], strides = [1, 1, 1]} : vector<8x8x128xf32> to vector<8x1x128xf32>
    %72 = vector.shape_cast %71 : vector<8x1x128xf32> to vector<8x128xf32>
    %73 = arith.truncf %64 : vector<8x128xf32> to vector<8x128xbf16>
    %cst_27 = arith.constant dense<0.000000e+00> : vector<8x128xf32>
    %74 = tpu.matmul %73, %3, %cst_27 {dimension_numbers = #tpu.dot_dimension_numbers<[1], [0], [0], [1], [0, 0, 1, 1], [], []>} : vector<8x128xbf16>, vector<128x128xbf16>, vector<8x128xf32> -> vector<8x128xf32>
    %75 = arith.addf %72, %74 : vector<8x128xf32>
    %76 = math.tanh %75 : vector<8x128xf32>
    %c3_i32 = arith.constant 3 : i32
    %77 = arith.addi %15, %c3_i32 : i32
    %78 = vector.broadcast %77 : i32 to vector<8x1xi32>
    %79 = arith.cmpi slt, %78, %4 : vector<8x1xi32>
    %80 = vector.shape_cast %79 : vector<8x1xi1> to vector<8x1xi1>
    %81 = vector.broadcast %80 : vector<8x1xi1> to vector<8x128xi1>
    %82 = arith.select %81, %76, %64 : vector<8x128xi1>, vector<8x128xf32>
    %cst_28 = arith.constant 0.000000e+00 : f32
    %83 = vector.shape_cast %79 : vector<8x1xi1> to vector<8x1xi1>
    %84 = vector.broadcast %83 : vector<8x1xi1> to vector<8x128xi1>
    %85 = vector.broadcast %cst_28 : f32 to vector<8x128xf32>
    %86 = arith.select %84, %76, %85 : vector<8x128xi1>, vector<8x128xf32>
    %87 = vector.shape_cast %86 : vector<8x128xf32> to vector<8x1x128xf32>
    %c0_29 = arith.constant 0 : index
    %c3 = arith.constant 3 : index
    %c0_30 = arith.constant 0 : index
    %88 = vector.load %arg7[%c0_29, %c3, %c0_30] : memref<8x8x128xf32, #tpu.memory_space<vmem>>, vector<8x1x128xf32>
    tpu.vector_store %arg7[%c0_29, %c3, %c0_30], %87 {strides = array<i32>} : memref<8x8x128xf32, #tpu.memory_space<vmem>>, vector<8x1x128xf32>,
    %89 = vector.extract_strided_slice %14 {offsets = [0, 4, 0], sizes = [8, 1, 128], strides = [1, 1, 1]} : vector<8x8x128xf32> to vector<8x1x128xf32>
    %90 = vector.shape_cast %89 : vector<8x1x128xf32> to vector<8x128xf32>
    %91 = arith.truncf %82 : vector<8x128xf32> to vector<8x128xbf16>
    %cst_31 = arith.constant dense<0.000000e+00> : vector<8x128xf32>
    %92 = tpu.matmul %91, %3, %cst_31 {dimension_numbers = #tpu.dot_dimension_numbers<[1], [0], [0], [1], [0, 0, 1, 1], [], []>} : vector<8x128xbf16>, vector<128x128xbf16>, vector<8x128xf32> -> vector<8x128xf32>
    %93 = arith.addf %90, %92 : vector<8x128xf32>
    %94 = math.tanh %93 : vector<8x128xf32>
    %c4_i32 = arith.constant 4 : i32
    %95 = arith.addi %15, %c4_i32 : i32
    %96 = vector.broadcast %95 : i32 to vector<8x1xi32>
    %97 = arith.cmpi slt, %96, %4 : vector<8x1xi32>
    %98 = vector.shape_cast %97 : vector<8x1xi1> to vector<8x1xi1>
    %99 = vector.broadcast %98 : vector<8x1xi1> to vector<8x128xi1>
    %100 = arith.select %99, %94, %82 : vector<8x128xi1>, vector<8x128xf32>
    %cst_32 = arith.constant 0.000000e+00 : f32
    %101 = vector.shape_cast %97 : vector<8x1xi1> to vector<8x1xi1>
    %102 = vector.broadcast %101 : vector<8x1xi1> to vector<8x128xi1>
    %103 = vector.broadcast %cst_32 : f32 to vector<8x128xf32>
    %104 = arith.select %102, %94, %103 : vector<8x128xi1>, vector<8x128xf32>
    %105 = vector.shape_cast %104 : vector<8x128xf32> to vector<8x1x128xf32>
    %c0_33 = arith.constant 0 : index
    %c4 = arith.constant 4 : index
    %c0_34 = arith.constant 0 : index
    %106 = vector.load %arg7[%c0_33, %c4, %c0_34] : memref<8x8x128xf32, #tpu.memory_space<vmem>>, vector<8x1x128xf32>
    tpu.vector_store %arg7[%c0_33, %c4, %c0_34], %105 {strides = array<i32>} : memref<8x8x128xf32, #tpu.memory_space<vmem>>, vector<8x1x128xf32>,
    %107 = vector.extract_strided_slice %14 {offsets = [0, 5, 0], sizes = [8, 1, 128], strides = [1, 1, 1]} : vector<8x8x128xf32> to vector<8x1x128xf32>
    %108 = vector.shape_cast %107 : vector<8x1x128xf32> to vector<8x128xf32>
    %109 = arith.truncf %100 : vector<8x128xf32> to vector<8x128xbf16>
    %cst_35 = arith.constant dense<0.000000e+00> : vector<8x128xf32>
    %110 = tpu.matmul %109, %3, %cst_35 {dimension_numbers = #tpu.dot_dimension_numbers<[1], [0], [0], [1], [0, 0, 1, 1], [], []>} : vector<8x128xbf16>, vector<128x128xbf16>, vector<8x128xf32> -> vector<8x128xf32>
    %111 = arith.addf %108, %110 : vector<8x128xf32>
    %112 = math.tanh %111 : vector<8x128xf32>
    %c5_i32 = arith.constant 5 : i32
    %113 = arith.addi %15, %c5_i32 : i32
    %114 = vector.broadcast %113 : i32 to vector<8x1xi32>
    %115 = arith.cmpi slt, %114, %4 : vector<8x1xi32>
    %116 = vector.shape_cast %115 : vector<8x1xi1> to vector<8x1xi1>
    %117 = vector.broadcast %116 : vector<8x1xi1> to vector<8x128xi1>
    %118 = arith.select %117, %112, %100 : vector<8x128xi1>, vector<8x128xf32>
    %cst_36 = arith.constant 0.000000e+00 : f32
    %119 = vector.shape_cast %115 : vector<8x1xi1> to vector<8x1xi1>
    %120 = vector.broadcast %119 : vector<8x1xi1> to vector<8x128xi1>
    %121 = vector.broadcast %cst_36 : f32 to vector<8x128xf32>
    %122 = arith.select %120, %112, %121 : vector<8x128xi1>, vector<8x128xf32>
    %123 = vector.shape_cast %122 : vector<8x128xf32> to vector<8x1x128xf32>
    %c0_37 = arith.constant 0 : index
    %c5 = arith.constant 5 : index
    %c0_38 = arith.constant 0 : index
    %124 = vector.load %arg7[%c0_37, %c5, %c0_38] : memref<8x8x128xf32, #tpu.memory_space<vmem>>, vector<8x1x128xf32>
    tpu.vector_store %arg7[%c0_37, %c5, %c0_38], %123 {strides = array<i32>} : memref<8x8x128xf32, #tpu.memory_space<vmem>>, vector<8x1x128xf32>,
    %125 = vector.extract_strided_slice %14 {offsets = [0, 6, 0], sizes = [8, 1, 128], strides = [1, 1, 1]} : vector<8x8x128xf32> to vector<8x1x128xf32>
    %126 = vector.shape_cast %125 : vector<8x1x128xf32> to vector<8x128xf32>
    %127 = arith.truncf %118 : vector<8x128xf32> to vector<8x128xbf16>
    %cst_39 = arith.constant dense<0.000000e+00> : vector<8x128xf32>
    %128 = tpu.matmul %127, %3, %cst_39 {dimension_numbers = #tpu.dot_dimension_numbers<[1], [0], [0], [1], [0, 0, 1, 1], [], []>} : vector<8x128xbf16>, vector<128x128xbf16>, vector<8x128xf32> -> vector<8x128xf32>
    %129 = arith.addf %126, %128 : vector<8x128xf32>
    %130 = math.tanh %129 : vector<8x128xf32>
    %c6_i32 = arith.constant 6 : i32
    %131 = arith.addi %15, %c6_i32 : i32
    %132 = vector.broadcast %131 : i32 to vector<8x1xi32>
    %133 = arith.cmpi slt, %132, %4 : vector<8x1xi32>
    %134 = vector.shape_cast %133 : vector<8x1xi1> to vector<8x1xi1>
    %135 = vector.broadcast %134 : vector<8x1xi1> to vector<8x128xi1>
    %136 = arith.select %135, %130, %118 : vector<8x128xi1>, vector<8x128xf32>
    %cst_40 = arith.constant 0.000000e+00 : f32
    %137 = vector.shape_cast %133 : vector<8x1xi1> to vector<8x1xi1>
    %138 = vector.broadcast %137 : vector<8x1xi1> to vector<8x128xi1>
    %139 = vector.broadcast %cst_40 : f32 to vector<8x128xf32>
    %140 = arith.select %138, %130, %139 : vector<8x128xi1>, vector<8x128xf32>
    %141 = vector.shape_cast %140 : vector<8x128xf32> to vector<8x1x128xf32>
    %c0_41 = arith.constant 0 : index
    %c6 = arith.constant 6 : index
    %c0_42 = arith.constant 0 : index
    %142 = vector.load %arg7[%c0_41, %c6, %c0_42] : memref<8x8x128xf32, #tpu.memory_space<vmem>>, vector<8x1x128xf32>
    tpu.vector_store %arg7[%c0_41, %c6, %c0_42], %141 {strides = array<i32>} : memref<8x8x128xf32, #tpu.memory_space<vmem>>, vector<8x1x128xf32>,
    %143 = vector.extract_strided_slice %14 {offsets = [0, 7, 0], sizes = [8, 1, 128], strides = [1, 1, 1]} : vector<8x8x128xf32> to vector<8x1x128xf32>
    %144 = vector.shape_cast %143 : vector<8x1x128xf32> to vector<8x128xf32>
    %145 = arith.truncf %136 : vector<8x128xf32> to vector<8x128xbf16>
    %cst_43 = arith.constant dense<0.000000e+00> : vector<8x128xf32>
    %146 = tpu.matmul %145, %3, %cst_43 {dimension_numbers = #tpu.dot_dimension_numbers<[1], [0], [0], [1], [0, 0, 1, 1], [], []>} : vector<8x128xbf16>, vector<128x128xbf16>, vector<8x128xf32> -> vector<8x128xf32>
    %147 = arith.addf %144, %146 : vector<8x128xf32>
    %148 = math.tanh %147 : vector<8x128xf32>
    %c7_i32 = arith.constant 7 : i32
    %149 = arith.addi %15, %c7_i32 : i32
    %150 = vector.broadcast %149 : i32 to vector<8x1xi32>
    %151 = arith.cmpi slt, %150, %4 : vector<8x1xi32>
    %152 = vector.shape_cast %151 : vector<8x1xi1> to vector<8x1xi1>
    %153 = vector.broadcast %152 : vector<8x1xi1> to vector<8x128xi1>
    %154 = arith.select %153, %148, %136 : vector<8x128xi1>, vector<8x128xf32>
    %cst_44 = arith.constant 0.000000e+00 : f32
    %155 = vector.shape_cast %151 : vector<8x1xi1> to vector<8x1xi1>
    %156 = vector.broadcast %155 : vector<8x1xi1> to vector<8x128xi1>
    %157 = vector.broadcast %cst_44 : f32 to vector<8x128xf32>
    %158 = arith.select %156, %148, %157 : vector<8x128xi1>, vector<8x128xf32>
    %159 = vector.shape_cast %158 : vector<8x128xf32> to vector<8x1x128xf32>
    %c0_45 = arith.constant 0 : index
    %c7 = arith.constant 7 : index
    %c0_46 = arith.constant 0 : index
    %160 = vector.load %arg7[%c0_45, %c7, %c0_46] : memref<8x8x128xf32, #tpu.memory_space<vmem>>, vector<8x1x128xf32>
    tpu.vector_store %arg7[%c0_45, %c7, %c0_46], %159 {strides = array<i32>} : memref<8x8x128xf32, #tpu.memory_space<vmem>>, vector<8x1x128xf32>,
    %c0_47 = arith.constant 0 : index
    %c0_48 = arith.constant 0 : index
    %161 = vector.load %arg9[%c0_47, %c0_48] : memref<8x128xf32, #tpu.memory_space<vmem>>, vector<8x128xf32>
    tpu.vector_store %arg9[%c0_47, %c0_48], %154 {strides = array<i32>} : memref<8x128xf32, #tpu.memory_space<vmem>>, vector<8x128xf32>,
    %c0_i32_49 = arith.constant 0 : i32
    %162 = arith.cmpi eq, %arg0, %c0_i32_49 : i32
    %163 = arith.extui %162 : i1 to i32
    %c0_i32_50 = arith.constant 0 : i32
    %164 = arith.cmpi ne, %163, %c0_i32_50 : i32
    scf.if %164 {
      %c0_51 = arith.constant 0 : index
      %c0_52 = arith.constant 0 : index
      %165 = vector.load %arg8[%c0_51, %c0_52] : memref<8x128xf32, #tpu.memory_space<vmem>>, vector<8x128xf32>
      tpu.vector_store %arg8[%c0_51, %c0_52], %154 {strides = array<i32>} : memref<8x128xf32, #tpu.memory_space<vmem>>, vector<8x128xf32>,
    } else {
    }
    return
  }
  func.func @transform_0(%arg0: i32) -> (i32, i32, i32) {
    %c0_i32 = arith.constant 0 : i32
    %c0_i32_0 = arith.constant 0 : i32
    %c0_i32_1 = arith.constant 0 : i32
    return %c0_i32, %arg0, %c0_i32_0 : i32, i32, i32
  }
  func.func @transform_1(%arg0: i32) -> (i32, i32) {
    %c0_i32 = arith.constant 0 : i32
    %c0_i32_0 = arith.constant 0 : i32
    %c0_i32_1 = arith.constant 0 : i32
    return %c0_i32, %c0_i32_0 : i32, i32
  }
  func.func @transform_2(%arg0: i32) -> (i32, i32) {
    %c0_i32 = arith.constant 0 : i32
    %c0_i32_0 = arith.constant 0 : i32
    %c0_i32_1 = arith.constant 0 : i32
    return %c0_i32, %c0_i32_0 : i32, i32
  }
  func.func @transform_3(%arg0: i32) -> (i32, i32) {
    %c0_i32 = arith.constant 0 : i32
    %c0_i32_0 = arith.constant 0 : i32
    %c0_i32_1 = arith.constant 0 : i32
    return %c0_i32, %c0_i32_0 : i32, i32
  }
  func.func @transform_4(%arg0: i32) -> (i32, i32) {
    %c0_i32 = arith.constant 0 : i32
    %c0_i32_0 = arith.constant 0 : i32
    %c0_i32_1 = arith.constant 0 : i32
    return %c0_i32, %c0_i32_0 : i32, i32
  }
  func.func @transform_5(%arg0: i32) -> (i32, i32) {
    %c0_i32 = arith.constant 0 : i32
    %c0_i32_0 = arith.constant 0 : i32
    %c0_i32_1 = arith.constant 0 : i32
    return %c0_i32, %c0_i32_0 : i32, i32
  }
  func.func @transform_6(%arg0: i32) -> (i32, i32, i32) {
    %c0_i32 = arith.constant 0 : i32
    %c0_i32_0 = arith.constant 0 : i32
    %c0_i32_1 = arith.constant 0 : i32
    return %c0_i32, %arg0, %c0_i32_0 : i32, i32, i32
  }
  func.func @transform_7(%arg0: i32) -> (i32, i32) {
    %c0_i32 = arith.constant 0 : i32
    %c0_i32_0 = arith.constant 0 : i32
    %c0_i32_1 = arith.constant 0 : i32
    return %c0_i32, %c0_i32_0 : i32, i32
  }
}

</mosaic_0001>

<bundles_post_ra>
// kernel: rnn_module_forward.2
= control target key start
LH: loop header
LB: loop body
LE: loop exit
PB: predicated region body
PF: predicated region fallthrough
CT: control target
= control target key end

     0   :  { %v2059_v0 = vmov 0.0   ;;  %vm2060_vm0 = vmmov 0   ;;  %v2061_v2 = vmov 0   ;;  %vm70_vm1 = vcmask 130048   ;;  %s2784_s3 = inlined_call_operand.vmem [shape: bf16[128,128], index: 3, kind: input, shape index: {}]   ;;  %s2785_s2 = inlined_call_operand.vmem [shape: bf16[16,128], index: 2, kind: input, shape index: {}]   ;;  %s2786_s0 = inlined_call_operand.vmem [shape: f32[8,8,16], index: 0, kind: input, shape index: {}]   ;;  %s2787_s5 = inlined_call_operand.vmem [shape: s32[8,1], index: 5, kind: input, shape index: {}]   ;;  %s2788_s1 = inlined_call_operand.vmem [shape: f32[8,128], index: 1, kind: input, shape index: {}]   ;;  %s2789_s4 = inlined_call_operand.vmem [shape: f32[1,128], index: 4, kind: input, shape index: {}]   ;;  %s2790_s6 = inlined_call_operand.vmem [shape: f32[8,8,128], index: 6, kind: output, shape index: {0}]   ;;  %s2791_s7 = inlined_call_operand.vmem [shape: f32[8,128], index: 7, kind: output, shape index: {1}]  }
   0x1   :  { %1748 = vmatprep.subr.bf16.mxu1 %v2059_v0  ;;  %v2107_v1 = vld [vmem:[%s2784_s3] sm:$0xff]   ;;  %1764 = vmatprep.mubr.msk.bf16.mxu1 %vm2060_vm0, %v2059_v0  ;;  %v2117_v3 = vld [vmem:[%s2784_s3 + $0x8] sm:$0xff]   ;;  %v2126_v5 = vld [vmem:[%s2784_s3 + $0x10] sm:$0xff]   ;;  %vm301_vm6 = vcmask 1041409   ;;  %vm304_vm7 = vcmask 1042434   ;;  %vm307_vm8 = vcmask 1043459  }
   0x2   :  { %1912 = vset.pattern.permute.xlu0 %v2061_v2  ;;  %1913 = vset.pattern.permute.xlu1 %v2061_v2  ;;  %v1918_v4 = vld [vmem:[%s2785_s2] sm:$0xff]   ;;  %v51_v7 = vld [vmem:[%s2786_s0 + $0x8] sm:$0xff]  ;;  %v52_v8 = vld [vmem:[%s2786_s0 + $0x10] sm:$0xff]  ;;  %vm310_vm9 = vcmask 1044484   ;;  %vm313_vm10 = vcmask 1045509   ;;  %vm316_vm11 = vcmask 1046534  }
   0x3   :  { %1749 = vmatpush3.bf16.msra.mxu1 %v2107_v1  ;;  %1738 = vmatprep.subr.bf16.mxu0 %v1918_v4  ;;  %v50_v6 = vld [vmem:[%s2786_s0] sm:$0xff]  ;;  %v53_v10 = vld [vmem:[%s2786_s0 + $0x18] sm:$0xff]  ;;  %v55_v13 = vld [vmem:[%s2786_s0 + $0x28] sm:$0xff]  ;;  %vm319_vm12 = vcmask 1047559  }
   0x4   :  { %1750 = vmatprep.subr.bf16.mxu1 %v2059_v0  ;;  %1739 = vmatpush3.bf16.msra.mxu0 %v1918_v4  ;;  %v58_v9 = vpack.c.bf16 %v51_v7, %v50_v6  ;;  %v59_v11 = vpack.c.bf16 %v53_v10, %v52_v8  ;;  %v54_v12 = vld [vmem:[%s2786_s0 + $0x20] sm:$0xff]  ;;  %v2154_v14 = vld [vmem:[%s2784_s3 + $0x18] sm:$0xff]   ;;  %v56_v16 = vld [vmem:[%s2786_s0 + $0x30] sm:$0xff]  ;;  %v2062_v8 = vmov 1966171168   ;;  %v329_v10 = vlaneseq }
   0x5   :  { %1768 = vmatprep.subr.bf16.mxu0 %v2059_v0  ;;  %v60_v15 = vpack.c.bf16 %v55_v13, %v54_v12  ;;  %v57_v17 = vld [vmem:[%s2786_s0 + $0x38] sm:$0xff]  ;;  %v2169_v18 = vld [vmem:[%s2787_s5] sm:$0xff]  ;;  %v2190_v23 = vld [vmem:[%s2784_s3 + $0x28] sm:$0xff]  }
   0x6   :  { %1740 = vmatprep.mubr.msk.bf16.mxu0 %vm70_vm1, %v58_v9  ;;  %vm1621_vm2 = vcmp.gt.s32.totalorder %v2169_v18, 0  ;;  %vm1626_vm3 = vcmp.gt.s32.totalorder %v2169_v18, 1  ;;  %v2178_v19 = vld [vmem:[%s2784_s3 + $0x20] sm:$0xff]   ;;  %v61_v20 = vpack.c.bf16 %v57_v17, %v56_v16  ;;  %vm1641_vm4 = vcmp.gt.s32.totalorder %v2169_v18, 4  ;;  %v2204_v25 = vld [vmem:[%s2784_s3 + $0x30] sm:$0xff]   ;;  %v2214_v27 = vld [vmem:[%s2784_s3 + $0x38] sm:$0xff]  }
   0x7   :  { %1751 = vmatpush3.bf16.msra.mxu1 %v2117_v3  ;;  %1741 = vmatmul.mubr.msk.bf16.vlgmr.msra.gmra.mrb[0].mxu0 %vm70_vm1, %v59_v11  ;;  %v287_v21 = vsel %vm1621_vm2, 1, %v2061_v2  ;;  %v466_v22 = vsel %vm1626_vm3, 1, %v2061_v2  ;;  %v982_v24 = vsel %vm1641_vm4, 1, %v2061_v2  ;;  %vm1651_vm5 = vcmp.gt.s32.totalorder %v2169_v18, 6  ;;  %v2219_v28 = vld [vmem:[%s2788_s1] sm:$0xff] }
   0x8   :  { %1752 = vmatprep.subr.bf16.mxu1 %v2059_v0  ;;  %1769 = vmatpush3.bf16.msra.mxu0 %v2107_v1  ;;  %v1326_v26 = vsel %vm1651_vm5, 1, %v2061_v2  ;;  %v164_v29 = vpack.c.bf16 %v2219_v28, %v2219_v28  ;;  %v1612_v38 = vld [vmem:[%s2789_s4] ss:$0 sm:$0xff]  ;;  %v327_v9 = vunpack.c.l.s4 %v2062_v8  ;;  %vm1631_vm14 = vcmp.gt.s32.totalorder %v2169_v18, 2 }
   0x9   :  { %1744 = vmatprep.mubr.msk.bf16.mxu0 %vm70_vm1, %v60_v15  ;;  %1770 = vmatprep.subr.bf16.mxu0 %v2059_v0  ;;  %vm1636_vm15 = vcmp.gt.s32.totalorder %v2169_v18, 3  ;;  %vm1656_vm2 = vcmp.gt.s32.totalorder %v2169_v18, 7 }
   0xa   :  { %289 = vperm.xlu0 %1912, %v287_v21   ;;  %v330_v21 = vshrl.u32 %v329_v10, 7  ;;  %v810_v8 = vsel %vm1636_vm15, 1, %v2061_v2  ;;  %v1498_v10 = vsel %vm1656_vm2, 1, %v2061_v2 }
   0xb   :  { %1753 = vmatpush3.bf16.msra.mxu1 %v2126_v5 }
   0xc   :  { %1754 = vmatprep.subr.bf16.mxu1 %v2059_v0  ;;  %1771 = vmatpush3.bf16.msra.mxu0 %v2117_v3 }
   0xd   :  { %1772 = vmatprep.subr.bf16.mxu0 %v2059_v0 }
   0xe   :  { %468 = vperm.xlu0 %1912, %v466_v22  }
   0xf   :  { %1755 = vmatpush3.bf16.msra.mxu1 %v2154_v14  ;;  %1745 = vmatmul.mubr.msk.bf16.gmra.mrb[4].mxu0 %vm70_vm1, %v61_v20  ;;  %v328_v20 = vunpack.c.0.s8 %v327_v9  ;;  %vm1646_vm1 = vcmp.gt.s32.totalorder %v2169_v18, 5 }
  0x10   :  { %1756 = vmatprep.subr.bf16.mxu1 %v2059_v0  ;;  %1773 = vmatpush3.bf16.msra.mxu0 %v2126_v5  ;;  %v1154_v9 = vsel %vm1646_vm1, 1, %v2061_v2 }
  0x11   :  { %1784 = vmatprep.mubr.msk.bf16.mxu0 %vm2060_vm0, %v2059_v0  ;;  %1774 = vmatprep.subr.bf16.mxu0 %v2059_v0 }
  0x12   :  { %984 = vperm.xlu0 %1912, %v982_v24  }
  0x13   :  { %1757 = vmatpush3.bf16.msra.mxu1 %v2178_v19 }
  0x14   :  { %1758 = vmatprep.subr.bf16.mxu1 %v2059_v0  ;;  %1775 = vmatpush3.bf16.msra.mxu0 %v2154_v14 }
  0x15   :  { %1776 = vmatprep.subr.bf16.mxu0 %v2059_v0 }
  0x16   :  { %1328 = vperm.xlu0 %1912, %v1326_v26  }
  0x17   :  { %1759 = vmatpush3.bf16.msra.mxu1 %v2190_v23 }
  0x18   :  { %1760 = vmatprep.subr.bf16.mxu1 %v2059_v0  ;;  %1777 = vmatpush3.bf16.msra.mxu0 %v2178_v19 }
  0x19   :  { %1778 = vmatprep.subr.bf16.mxu0 %v2059_v0 }
  0x1b   :  { %1761 = vmatpush3.bf16.msra.mxu1 %v2204_v25 }
  0x1c   :  { %1762 = vmatprep.subr.bf16.mxu1 %v2059_v0  ;;  %1779 = vmatpush3.bf16.msra.mxu0 %v2190_v23 }
  0x1d   :  { %1780 = vmatprep.subr.bf16.mxu0 %v2059_v0 }
  0x1f   :  { %1763 = vmatpush3.bf16.msra.mxu1 %v2214_v27 }
  0x20   :  { %1788 = vmatprep.subr.bf16.mxu1 %v2059_v0  ;;  %1781 = vmatpush3.bf16.msra.mxu0 %v2204_v25 }
  0x21   :  { %1782 = vmatprep.subr.bf16.mxu0 %v2059_v0 }
  0x22   :  { %1765 = vmatmul.mubr.bf16.vlgmr.msra.gmra.mrb[0].mxu1 %v164_v29 }
  0x23   :  { %1789 = vmatpush3.bf16.msra.mxu1 %v2107_v1  ;;  %1804 = vmatprep.mubr.msk.bf16.mxu1 %vm2060_vm0, %v2059_v0 }
  0x24   :  { %1790 = vmatprep.subr.bf16.mxu1 %v2059_v0  ;;  %1783 = vmatpush3.bf16.msra.mxu0 %v2214_v27 }
  0x25   :  { %1808 = vmatprep.subr.bf16.mxu0 %v2059_v0 }
  0x27   :  { %1791 = vmatpush3.bf16.msra.mxu1 %v2117_v3 }
  0x28   :  { %1792 = vmatprep.subr.bf16.mxu1 %v2059_v0 }
  0x2b   :  { %1793 = vmatpush3.bf16.msra.mxu1 %v2126_v5 }
  0x2c   :  { %1794 = vmatprep.subr.bf16.mxu1 %v2059_v0 }
  0x2f   :  { %1795 = vmatpush3.bf16.msra.mxu1 %v2154_v14 }
  0x30   :  { %1796 = vmatprep.subr.bf16.mxu1 %v2059_v0 }
  0x33   :  { %1797 = vmatpush3.bf16.msra.mxu1 %v2178_v19 }
  0x34   :  { %1798 = vmatprep.subr.bf16.mxu1 %v2059_v0 }
  0x37   :  { %1799 = vmatpush3.bf16.msra.mxu1 %v2190_v23 }
  0x38   :  { %1800 = vmatprep.subr.bf16.mxu1 %v2059_v0 }
  0x3b   :  { %1801 = vmatpush3.bf16.msra.mxu1 %v2204_v25 }
  0x3c   :  { %1802 = vmatprep.subr.bf16.mxu1 %v2059_v0 }
  0x3f   :  { %1803 = vmatpush3.bf16.msra.mxu1 %v2214_v27 }
  0x40   :  { %1828 = vmatprep.subr.bf16.mxu1 %v2059_v0 }
  0xda   :  { %v1742_v30 = vpop.f32.mrb[0].mxu0 }
  0xdb   :  { %v117_v31 = vpop.f32.mrb[1].mxu0  ;;  %v2255_v39 = vadd.f32 %v1742_v30, %v1612_v38 }
  0xdc   :  { %v1743_v32 = vpop.f32.mrb[2].mxu0  ;;  %v2257_v40 = vadd.f32 %v1612_v38, %v117_v31 }
  0xdd   :  { %v120_v33 = vpop.f32.mrb[3].mxu0  ;;  %v2259_v41 = vadd.f32 %v1743_v32, %v1612_v38 }
  0xde   :  { %v2261_v42 = vadd.f32 %v1612_v38, %v120_v33 }
  0xe2   :  { %v1746_v34 = vpop.f32.mrb[4].mxu0 }
  0xe3   :  { %v133_v35 = vpop.f32.mrb[5].mxu0  ;;  %v2263_v43 = vadd.f32 %v1746_v34, %v1612_v38 }
  0xe4   :  { %v1747_v36 = vpop.f32.mrb[6].mxu0  ;;  %v2265_v44 = vadd.f32 %v1612_v38, %v133_v35  ;;  %v290_v35 = vpop.permute.xlu0 %289 }
  0xe5   :  { %v136_v37 = vpop.f32.mrb[7].mxu0  ;;  %v2270_v52 = vadd.f32 %v1747_v36, %v1612_v38  ;;  %vm291_vm13 = vcmp.eq.s32.totalorder %v290_v35, 1 }
  0xe6   :  { %v2267_v45 = vadd.f32 %v1612_v38, %v136_v37  ;;  %v2283_v38 = vsub.s32 %v328_v20, %v330_v21 }
  0xf5   :  { %v247_v46 = vpop.f32.mrb[0].mxu1 }
  0xf6   :  { %v254_v47 = vrot.slane %v247_v46, 1  ;;  %v255_v48 = vrot.slane %v247_v46, 2  ;;  %v256_v49 = vrot.slane %v247_v46, 3  ;;  %v269_v50 = vadd.f32 %v247_v46, %v2257_v40  ;;  %v1766_v51 = vpop.f32.mrb[1].mxu1 }
  0xf7   :  { %v250_v53 = vpop.f32.mrb[2].mxu1  ;;  %v257_v54 = vrot.slane %v247_v46, 4  ;;  %v258_v55 = vrot.slane %v247_v46, 5  ;;  %v259_v56 = vrot.slane %v247_v46, 6  ;;  %v260_v59 = vrot.slane %v247_v46, 7 }
  0xf8   :  { %v270_v57 = vadd.f32 %v254_v47, %v2261_v42  ;;  %v1767_v58 = vpop.f32.mrb[3].mxu1  ;;  %v271_v60 = vadd.f32 %v255_v48, %v2255_v39  ;;  %v272_v61 = vadd.f32 %v256_v49, %v2259_v41  ;;  %1923 = vtanh.f32 %v269_v50 }
  0xf9   :  { %v273_v62 = vadd.f32 %v257_v54, %v2265_v44  ;;  %v274_v63 = vadd.f32 %v258_v55, %v2267_v45  ;;  %v275_v4 = vadd.f32 %v259_v56, %v2263_v43  ;;  %v276_v6 = vadd.f32 %v260_v59, %v2270_v52 }
  0xfa   :  { %1925 = vtanh.f32 %v270_v57 }
  0xfb   :  { %1927 = vtanh.f32 %v271_v60 }
  0xfc   :  { %1929 = vtanh.f32 %v272_v61 }
  0xfd   :  { %1931 = vtanh.f32 %v273_v62 }
  0xfe   :  { %1933 = vtanh.f32 %v274_v63 }
  0xff   :  { %1935 = vtanh.f32 %v275_v4 }
 0x100   :  { %1937 = vtanh.f32 %v276_v6 }
 0x102   :  { %v1924_v7 = vpop.eup %1923 }
 0x104   :  { %v1926_v11 = vpop.eup %1925 }
 0x105   :  { %v1928_v12 = vpop.eup %1927  ;;  %v300_v13 = vrot.slane %v1926_v11, 7 }
 0x106   :  { %v1930_v15 = vpop.eup %1929  ;;  %v303_v16 = vrot.slane %v1928_v12, 6 }
 0x107   :  { %v1932_v17 = vpop.eup %1931  ;;  %v302_v22 = vsel %vm301_vm6, %v300_v13, %v1924_v7  ;;  %v306_v24 = vrot.slane %v1930_v15, 5  ;;  %v638_v7 = vsel %vm1631_vm14, 1, %v2061_v2 }
 0x108   :  { %v1934_v26 = vpop.eup %1933  ;;  %v305_v29 = vsel %vm304_vm7, %v303_v16, %v302_v22  ;;  %v309_v30 = vrot.slane %v1932_v17, 4  ;;  %640 = vperm.xlu1 %1913, %v638_v7  }
 0x109   :  { %v1936_v31 = vpop.eup %1935  ;;  %v308_v32 = vsel %vm307_vm8, %v306_v24, %v305_v29  ;;  %v312_v33 = vrot.slane %v1934_v26, 3 }
 0x10a   :  { %v1938_v34 = vpop.eup %1937  ;;  %v311_v36 = vsel %vm310_vm9, %v309_v30, %v308_v32  ;;  %v315_v37 = vrot.slane %v1936_v31, 2 }
 0x10b   :  { %v314_v46 = vsel %vm313_vm10, %v312_v33, %v311_v36  ;;  %v318_v47 = vrot.slane %v1938_v34, 1 }
 0x10c   :  { %v317_v48 = vsel %vm316_vm11, %v315_v37, %v314_v46  ;;  %812 = vperm.xlu1 %1913, %v810_v8  }
 0x10d   :  { %v320_v49 = vsel %vm319_vm12, %v318_v47, %v317_v48 }
 0x10e   :  { %v2289_v50 = vsel %vm291_vm13, %v320_v49, %v2219_v28  ;;  %v323_v51 = vsel %vm291_vm13, %v320_v49, 0.0 }
 0x10f   :  { %v325_v53 = vcombine.high %v323_v51, %v323_v51  ;;  %v332_v54 = vrot.slane %v323_v51, %v2283_v38  ;;  %v390_v55 = vpack.c.bf16 %v2289_v50, %v2289_v50 }
 0x110   :  { %1156 = vperm.xlu1 %1913, %v1154_v9  }
 0x111   :  { %v339_v56 = vrot.slane %v325_v53, %v2283_v38  ;;  %v340_v57 = vcombine.high %v332_v54, %v332_v54  ;;  %v348_v58 = vrot.slane %v332_v54, %v2283_v38  ;;  %1622 = vst.sshfl [vmem:[%s2790_s6] sm:$0x1 pattern:$0x73625140] %v332_v54  ;;  %1785 = vmatmul.mubr.bf16.vlgmr.msra.gmra.mrb[8].mxu0 %v390_v55 }
 0x112   :  { %1809 = vmatpush3.bf16.msra.mxu0 %v2107_v1  ;;  %1824 = vmatprep.mubr.msk.bf16.mxu0 %vm2060_vm0, %v2059_v0 }
 0x113   :  { %v341_v28 = vcombine.high %v339_v56, %v339_v56  ;;  %v355_v59 = vrot.slane %v339_v56, %v2283_v38  ;;  %v362_v60 = vrot.slane %v340_v57, %v2283_v38  ;;  %v370_v61 = vcombine.high %v348_v58, %v348_v58  ;;  %1623 = vst.sshfl [vmem:[%s2790_s6 + $0x8] sm:$0x1 pattern:$0x73625140] %v340_v57 }
 0x114   :  { %1624 = vst.sshfl [vmem:[%s2790_s6 + $0x20] sm:$0x1 pattern:$0x73625140] %v339_v56  ;;  %1810 = vmatprep.subr.bf16.mxu0 %v2059_v0  ;;  %1500 = vperm.xlu1 %1913, %v1498_v10  }
 0x115   :  { %v369_v62 = vrot.slane %v341_v28, %v2283_v38  ;;  %v371_v63 = vcombine.high %v355_v59, %v355_v59  ;;  %v372_v4 = vcombine.high %v362_v60, %v362_v60  ;;  %384 = vst [vmem:[%s2790_s6 + $0x10] sm:$0x1] %v370_v61  ;;  %1625 = vst.sshfl [vmem:[%s2790_s6 + $0x28] sm:$0x1 pattern:$0x73625140] %v341_v28 }
 0x116   :  { %1811 = vmatpush3.bf16.msra.mxu0 %v2117_v3 }
 0x117   :  { %v373_v6 = vcombine.high %v369_v62, %v369_v62  ;;  %385 = vst [vmem:[%s2790_s6 + $0x18] sm:$0x1] %v372_v4  ;;  %388 = vst [vmem:[%s2790_s6 + $0x30] sm:$0x1] %v371_v63  ;;  %1812 = vmatprep.subr.bf16.mxu0 %v2059_v0  ;;  %v469_v4 = vpop.permute.xlu0 %468 }
 0x118   :  { %vm470_vm3 = vcmp.eq.s32.totalorder %v469_v4, 1 }
 0x119   :  { %389 = vst [vmem:[%s2790_s6 + $0x38] sm:$0x1] %v373_v6 }
 0x11a   :  { %1813 = vmatpush3.bf16.msra.mxu0 %v2126_v5 }
 0x11b   :  { %1814 = vmatprep.subr.bf16.mxu0 %v2059_v0 }
 0x11e   :  { %1815 = vmatpush3.bf16.msra.mxu0 %v2154_v14 }
 0x11f   :  { %1816 = vmatprep.subr.bf16.mxu0 %v2059_v0 }
 0x122   :  { %1817 = vmatpush3.bf16.msra.mxu0 %v2178_v19 }
 0x123   :  { %1818 = vmatprep.subr.bf16.mxu0 %v2059_v0 }
 0x126   :  { %1819 = vmatpush3.bf16.msra.mxu0 %v2190_v23 }
 0x127   :  { %1820 = vmatprep.subr.bf16.mxu0 %v2059_v0 }
 0x12a   :  { %1821 = vmatpush3.bf16.msra.mxu0 %v2204_v25 }
 0x12b   :  { %1822 = vmatprep.subr.bf16.mxu0 %v2059_v0 }
 0x12e   :  { %1823 = vmatpush3.bf16.msra.mxu0 %v2214_v27 }
 0x12f   :  { %1848 = vmatprep.subr.bf16.mxu0 %v2059_v0 }
 0x1e4   :  { %v425_v11 = vpop.f32.mrb[8].mxu0 }
 0x1e5   :  { %v432_v12 = vrot.slane %v425_v11, 7  ;;  %v433_v13 = vrot.slane %v425_v11, 1  ;;  %v434_v15 = vrot.slane %v425_v11, 2  ;;  %v435_v16 = vrot.slane %v425_v11, 3  ;;  %v1786_v17 = vpop.f32.mrb[9].mxu0 }
 0x1e6   :  { %v436_v20 = vrot.slane %v425_v11, 4  ;;  %v437_v21 = vrot.slane %v425_v11, 5  ;;  %v448_v22 = vadd.f32 %v425_v11, %v2261_v42  ;;  %v428_v24 = vpop.f32.mrb[10].mxu0  ;;  %v438_v26 = vrot.slane %v425_v11, 6 }
 0x1e7   :  { %v447_v29 = vadd.f32 %v432_v12, %v2257_v40  ;;  %v449_v18 = vadd.f32 %v433_v13, %v2255_v39  ;;  %v450_v30 = vadd.f32 %v434_v15, %v2259_v41  ;;  %v1787_v2 = vpop.f32.mrb[11].mxu0  ;;  %v451_v31 = vadd.f32 %v435_v16, %v2265_v44 }
 0x1e8   :  { %1939 = vtanh.f32 %v448_v22  ;;  %v452_v32 = vadd.f32 %v436_v20, %v2267_v45  ;;  %v453_v33 = vadd.f32 %v437_v21, %v2263_v43  ;;  %v454_v34 = vadd.f32 %v438_v26, %v2270_v52 }
 0x1e9   :  { %1941 = vtanh.f32 %v447_v29 }
 0x1ea   :  { %1943 = vtanh.f32 %v449_v18 }
 0x1eb   :  { %1945 = vtanh.f32 %v450_v30 }
 0x1ec   :  { %1947 = vtanh.f32 %v451_v31 }
 0x1ed   :  { %1949 = vtanh.f32 %v452_v32 }
 0x1ee   :  { %1951 = vtanh.f32 %v453_v33 }
 0x1ef   :  { %1953 = vtanh.f32 %v454_v34 }
 0x1f2   :  { %v1940_v35 = vpop.eup %1939 }
 0x1f3   :  { %v1942_v36 = vpop.eup %1941 }
 0x1f4   :  { %v1944_v37 = vpop.eup %1943  ;;  %v479_v46 = vrot.slane %v1942_v36, 1 }
 0x1f5   :  { %v1946_v47 = vpop.eup %1945  ;;  %v481_v48 = vrot.slane %v1944_v37, 7 }
 0x1f6   :  { %v1948_v49 = vpop.eup %1947  ;;  %v480_v51 = vsel %vm301_vm6, %v1940_v35, %v479_v46  ;;  %v483_v53 = vrot.slane %v1946_v47, 6 }
 0x1f7   :  { %v1950_v54 = vpop.eup %1949  ;;  %v482_v55 = vsel %vm304_vm7, %v481_v48, %v480_v51  ;;  %v485_v56 = vrot.slane %v1948_v49, 5 }
 0x1f8   :  { %v1952_v57 = vpop.eup %1951  ;;  %v484_v58 = vsel %vm307_vm8, %v483_v53, %v482_v55  ;;  %v487_v28 = vrot.slane %v1950_v54, 4 }
 0x1f9   :  { %v1954_v59 = vpop.eup %1953  ;;  %v486_v60 = vsel %vm310_vm9, %v485_v56, %v484_v58  ;;  %v489_v61 = vrot.slane %v1952_v57, 3 }
 0x1fa   :  { %v488_v62 = vsel %vm313_vm10, %v487_v28, %v486_v60  ;;  %v491_v63 = vrot.slane %v1954_v59, 2 }
 0x1fb   :  { %v490_v6 = vsel %vm316_vm11, %v489_v61, %v488_v62 }
 0x1fc   :  { %v492_v7 = vsel %vm319_vm12, %v491_v63, %v490_v6 }
 0x1fd   :  { %v2365_v8 = vsel %vm470_vm3, %v492_v7, %v2289_v50  ;;  %v495_v9 = vsel %vm470_vm3, %v492_v7, 0.0 }
 0x1fe   :  { %v497_v10 = vcombine.high %v495_v9, %v495_v9  ;;  %v504_v11 = vrot.slane %v495_v9, %v2283_v38  ;;  %v562_v12 = vpack.c.bf16 %v2365_v8, %v2365_v8 }
 0x200   :  { %v511_v13 = vrot.slane %v497_v10, %v2283_v38  ;;  %v512_v15 = vcombine.high %v504_v11, %v504_v11  ;;  %v520_v16 = vrot.slane %v504_v11, %v2283_v38  ;;  %1627 = vst.sshfl [vmem:[%s2790_s6 + $0x1] sm:$0x1 pattern:$0x73625140] %v504_v11  ;;  %1805 = vmatmul.mubr.bf16.vlgmr.msra.gmra.mrb[4].mxu1 %v562_v12 }
 0x201   :  { %1829 = vmatpush3.bf16.msra.mxu1 %v2107_v1  ;;  %1844 = vmatprep.mubr.msk.bf16.mxu1 %vm2060_vm0, %v2059_v0 }
 0x202   :  { %v513_v50 = vcombine.high %v511_v13, %v511_v13  ;;  %v527_v17 = vrot.slane %v511_v13, %v2283_v38  ;;  %v534_v20 = vrot.slane %v512_v15, %v2283_v38  ;;  %v542_v21 = vcombine.high %v520_v16, %v520_v16  ;;  %1628 = vst.sshfl [vmem:[%s2790_s6 + $0x9] sm:$0x1 pattern:$0x73625140] %v512_v15  ;;  %v641_v15 = vpop.permute.xlu1 %640 }
 0x203   :  { %1629 = vst.sshfl [vmem:[%s2790_s6 + $0x21] sm:$0x1 pattern:$0x73625140] %v511_v13  ;;  %1830 = vmatprep.subr.bf16.mxu1 %v2059_v0  ;;  %vm642_vm4 = vcmp.eq.s32.totalorder %v641_v15, 1 }
 0x204   :  { %v541_v22 = vrot.slane %v513_v50, %v2283_v38  ;;  %v543_v24 = vcombine.high %v527_v17, %v527_v17  ;;  %v544_v26 = vcombine.high %v534_v20, %v534_v20  ;;  %556 = vst [vmem:[%s2790_s6 + $0x11] sm:$0x1] %v542_v21  ;;  %1630 = vst.sshfl [vmem:[%s2790_s6 + $0x29] sm:$0x1 pattern:$0x73625140] %v513_v50 }
 0x205   :  { %1831 = vmatpush3.bf16.msra.mxu1 %v2117_v3 }
 0x206   :  { %v545_v29 = vcombine.high %v541_v22, %v541_v22  ;;  %557 = vst [vmem:[%s2790_s6 + $0x19] sm:$0x1] %v544_v26  ;;  %560 = vst [vmem:[%s2790_s6 + $0x31] sm:$0x1] %v543_v24  ;;  %1832 = vmatprep.subr.bf16.mxu1 %v2059_v0 }
 0x208   :  { %561 = vst [vmem:[%s2790_s6 + $0x39] sm:$0x1] %v545_v29 }
 0x209   :  { %1833 = vmatpush3.bf16.msra.mxu1 %v2126_v5 }
 0x20a   :  { %1834 = vmatprep.subr.bf16.mxu1 %v2059_v0 }
 0x20d   :  { %1835 = vmatpush3.bf16.msra.mxu1 %v2154_v14 }
 0x20e   :  { %1836 = vmatprep.subr.bf16.mxu1 %v2059_v0 }
 0x211   :  { %1837 = vmatpush3.bf16.msra.mxu1 %v2178_v19 }
 0x212   :  { %1838 = vmatprep.subr.bf16.mxu1 %v2059_v0 }
 0x215   :  { %1839 = vmatpush3.bf16.msra.mxu1 %v2190_v23 }
 0x216   :  { %1840 = vmatprep.subr.bf16.mxu1 %v2059_v0 }
 0x219   :  { %1841 = vmatpush3.bf16.msra.mxu1 %v2204_v25 }
 0x21a   :  { %1842 = vmatprep.subr.bf16.mxu1 %v2059_v0 }
 0x21d   :  { %1843 = vmatpush3.bf16.msra.mxu1 %v2214_v27 }
 0x21e   :  { %1868 = vmatprep.subr.bf16.mxu1 %v2059_v0 }
 0x2d3   :  { %v597_v18 = vpop.f32.mrb[4].mxu1 }
 0x2d4   :  { %v604_v30 = vrot.slane %v597_v18, 6  ;;  %v605_v2 = vrot.slane %v597_v18, 7  ;;  %v606_v31 = vrot.slane %v597_v18, 1  ;;  %v621_v32 = vadd.f32 %v597_v18, %v2255_v39  ;;  %v1806_v33 = vpop.f32.mrb[5].mxu1 }
 0x2d5   :  { %v600_v34 = vpop.f32.mrb[6].mxu1  ;;  %v607_v35 = vrot.slane %v597_v18, 2  ;;  %v608_v36 = vrot.slane %v597_v18, 3  ;;  %v609_v37 = vrot.slane %v597_v18, 4  ;;  %v610_v49 = vrot.slane %v597_v18, 5 }
 0x2d6   :  { %v619_v46 = vadd.f32 %v604_v30, %v2257_v40  ;;  %v620_v47 = vadd.f32 %v605_v2, %v2261_v42  ;;  %v1807_v48 = vpop.f32.mrb[7].mxu1  ;;  %v622_v51 = vadd.f32 %v606_v31, %v2259_v41  ;;  %1955 = vtanh.f32 %v621_v32 }
 0x2d7   :  { %v623_v53 = vadd.f32 %v607_v35, %v2265_v44  ;;  %v624_v54 = vadd.f32 %v608_v36, %v2267_v45  ;;  %v625_v55 = vadd.f32 %v609_v37, %v2263_v43  ;;  %v626_v56 = vadd.f32 %v610_v49, %v2270_v52 }
 0x2d8   :  { %1957 = vtanh.f32 %v619_v46 }
 0x2d9   :  { %1959 = vtanh.f32 %v620_v47 }
 0x2da   :  { %1961 = vtanh.f32 %v622_v51 }
 0x2db   :  { %1963 = vtanh.f32 %v623_v53 }
 0x2dc   :  { %1965 = vtanh.f32 %v624_v54 }
 0x2dd   :  { %1967 = vtanh.f32 %v625_v55 }
 0x2de   :  { %1969 = vtanh.f32 %v626_v56 }
 0x2e0   :  { %v1956_v57 = vpop.eup %1955 }
 0x2e2   :  { %v1958_v58 = vpop.eup %1957 }
 0x2e3   :  { %v1960_v28 = vpop.eup %1959  ;;  %v651_v59 = vrot.slane %v1958_v58, 2 }
 0x2e4   :  { %v1962_v60 = vpop.eup %1961  ;;  %v652_v61 = vrot.slane %v1960_v28, 1 }
 0x2e5   :  { %v1964_v62 = vpop.eup %1963  ;;  %v655_v6 = vrot.slane %v1962_v60, 7 }
 0x2e6   :  { %v1966_v63 = vpop.eup %1965  ;;  %v653_v4 = vsel %vm301_vm6, %v652_v61, %v651_v59  ;;  %v657_v10 = vrot.slane %v1964_v62, 6 }
 0x2e7   :  { %v1968_v7 = vpop.eup %1967  ;;  %v654_v9 = vsel %vm304_vm7, %v1956_v57, %v653_v4  ;;  %v659_v13 = vrot.slane %v1966_v63, 5 }
 0x2e8   :  { %v1970_v11 = vpop.eup %1969  ;;  %v656_v12 = vsel %vm307_vm8, %v655_v6, %v654_v9  ;;  %v661_v50 = vrot.slane %v1968_v7, 4 }
 0x2e9   :  { %v658_v16 = vsel %vm310_vm9, %v657_v10, %v656_v12  ;;  %v663_v20 = vrot.slane %v1970_v11, 3 }
 0x2ea   :  { %v660_v17 = vsel %vm313_vm10, %v659_v13, %v658_v16 }
 0x2eb   :  { %v662_v21 = vsel %vm316_vm11, %v661_v50, %v660_v17 }
 0x2ec   :  { %v664_v22 = vsel %vm319_vm12, %v663_v20, %v662_v21 }
 0x2ed   :  { %v2433_v24 = vsel %vm642_vm4, %v664_v22, %v2365_v8  ;;  %v667_v26 = vsel %vm642_vm4, %v664_v22, 0.0 }
 0x2ee   :  { %v669_v29 = vcombine.high %v667_v26, %v667_v26  ;;  %v676_v18 = vrot.slane %v667_v26, %v2283_v38  ;;  %v734_v30 = vpack.c.bf16 %v2433_v24, %v2433_v24 }
 0x2f0   :  { %v683_v2 = vrot.slane %v669_v29, %v2283_v38  ;;  %v684_v31 = vcombine.high %v676_v18, %v676_v18  ;;  %v692_v32 = vrot.slane %v676_v18, %v2283_v38  ;;  %1632 = vst.sshfl [vmem:[%s2790_s6 + $0x2] sm:$0x1 pattern:$0x73625140] %v676_v18  ;;  %1825 = vmatmul.mubr.bf16.vlgmr.msra.gmra.mrb[12].mxu0 %v734_v30 }
 0x2f1   :  { %1849 = vmatpush3.bf16.msra.mxu0 %v2107_v1  ;;  %1864 = vmatprep.mubr.msk.bf16.mxu0 %vm2060_vm0, %v2059_v0 }
 0x2f2   :  { %v685_v8 = vcombine.high %v683_v2, %v683_v2  ;;  %v699_v33 = vrot.slane %v683_v2, %v2283_v38  ;;  %v706_v34 = vrot.slane %v684_v31, %v2283_v38  ;;  %v714_v35 = vcombine.high %v692_v32, %v692_v32  ;;  %1633 = vst.sshfl [vmem:[%s2790_s6 + $0xa] sm:$0x1 pattern:$0x73625140] %v684_v31 }
 0x2f3   :  { %1634 = vst.sshfl [vmem:[%s2790_s6 + $0x22] sm:$0x1 pattern:$0x73625140] %v683_v2  ;;  %1850 = vmatprep.subr.bf16.mxu0 %v2059_v0 }
 0x2f4   :  { %v713_v36 = vrot.slane %v685_v8, %v2283_v38  ;;  %v715_v37 = vcombine.high %v699_v33, %v699_v33  ;;  %v716_v46 = vcombine.high %v706_v34, %v706_v34  ;;  %728 = vst [vmem:[%s2790_s6 + $0x12] sm:$0x1] %v714_v35  ;;  %1635 = vst.sshfl [vmem:[%s2790_s6 + $0x2a] sm:$0x1 pattern:$0x73625140] %v685_v8  ;;  %v813_v34 = vpop.permute.xlu1 %812 }
 0x2f5   :  { %1851 = vmatpush3.bf16.msra.mxu0 %v2117_v3  ;;  %vm814_vm5 = vcmp.eq.s32.totalorder %v813_v34, 1 }
 0x2f6   :  { %v717_v47 = vcombine.high %v713_v36, %v713_v36  ;;  %729 = vst [vmem:[%s2790_s6 + $0x1a] sm:$0x1] %v716_v46  ;;  %732 = vst [vmem:[%s2790_s6 + $0x32] sm:$0x1] %v715_v37  ;;  %1852 = vmatprep.subr.bf16.mxu0 %v2059_v0 }
 0x2f8   :  { %733 = vst [vmem:[%s2790_s6 + $0x3a] sm:$0x1] %v717_v47 }
 0x2f9   :  { %1853 = vmatpush3.bf16.msra.mxu0 %v2126_v5 }
 0x2fa   :  { %1854 = vmatprep.subr.bf16.mxu0 %v2059_v0 }
 0x2fd   :  { %1855 = vmatpush3.bf16.msra.mxu0 %v2154_v14 }
 0x2fe   :  { %1856 = vmatprep.subr.bf16.mxu0 %v2059_v0 }
 0x301   :  { %1857 = vmatpush3.bf16.msra.mxu0 %v2178_v19 }
 0x302   :  { %1858 = vmatprep.subr.bf16.mxu0 %v2059_v0 }
 0x305   :  { %1859 = vmatpush3.bf16.msra.mxu0 %v2190_v23 }
 0x306   :  { %1860 = vmatprep.subr.bf16.mxu0 %v2059_v0 }
 0x309   :  { %1861 = vmatpush3.bf16.msra.mxu0 %v2204_v25 }
 0x30a   :  { %1862 = vmatprep.subr.bf16.mxu0 %v2059_v0 }
 0x30d   :  { %1863 = vmatpush3.bf16.msra.mxu0 %v2214_v27 }
 0x30e   :  { %1888 = vmatprep.subr.bf16.mxu0 %v2059_v0 }
 0x3c3   :  { %v769_v48 = vpop.f32.mrb[12].mxu0 }
 0x3c4   :  { %v776_v49 = vrot.slane %v769_v48, 5  ;;  %v777_v51 = vrot.slane %v769_v48, 6  ;;  %v778_v53 = vrot.slane %v769_v48, 7  ;;  %v779_v54 = vrot.slane %v769_v48, 1  ;;  %v1826_v55 = vpop.f32.mrb[13].mxu0 }
 0x3c5   :  { %v780_v56 = vrot.slane %v769_v48, 2  ;;  %v781_v57 = vrot.slane %v769_v48, 3  ;;  %v794_v58 = vadd.f32 %v769_v48, %v2259_v41  ;;  %v772_v28 = vpop.f32.mrb[14].mxu0  ;;  %v782_v59 = vrot.slane %v769_v48, 4 }
 0x3c6   :  { %v791_v60 = vadd.f32 %v776_v49, %v2257_v40  ;;  %v792_v61 = vadd.f32 %v777_v51, %v2261_v42  ;;  %v793_v62 = vadd.f32 %v778_v53, %v2255_v39  ;;  %v1827_v63 = vpop.f32.mrb[15].mxu0  ;;  %v795_v4 = vadd.f32 %v779_v54, %v2265_v44 }
 0x3c7   :  { %1971 = vtanh.f32 %v794_v58  ;;  %v796_v6 = vadd.f32 %v780_v56, %v2267_v45  ;;  %v797_v7 = vadd.f32 %v781_v57, %v2263_v43  ;;  %v798_v9 = vadd.f32 %v782_v59, %v2270_v52 }
 0x3c8   :  { %1973 = vtanh.f32 %v791_v60 }
 0x3c9   :  { %1975 = vtanh.f32 %v792_v61 }
 0x3ca   :  { %1977 = vtanh.f32 %v793_v62 }
 0x3cb   :  { %1979 = vtanh.f32 %v795_v4 }
 0x3cc   :  { %1981 = vtanh.f32 %v796_v6 }
 0x3cd   :  { %1983 = vtanh.f32 %v797_v7 }
 0x3ce   :  { %1985 = vtanh.f32 %v798_v9 }
 0x3d1   :  { %v1972_v10 = vpop.eup %1971 }
 0x3d2   :  { %v1974_v11 = vpop.eup %1973 }
 0x3d3   :  { %v1976_v12 = vpop.eup %1975  ;;  %v823_v13 = vrot.slane %v1974_v11, 3 }
 0x3d4   :  { %v1978_v15 = vpop.eup %1977  ;;  %v824_v16 = vrot.slane %v1976_v12, 2 }
 0x3d5   :  { %v1980_v50 = vpop.eup %1979  ;;  %v826_v17 = vrot.slane %v1978_v15, 1 }
 0x3d6   :  { %v1982_v20 = vpop.eup %1981  ;;  %v825_v21 = vsel %vm301_vm6, %v824_v16, %v823_v13  ;;  %v829_v29 = vrot.slane %v1980_v50, 7 }
 0x3d7   :  { %v1984_v22 = vpop.eup %1983  ;;  %v827_v26 = vsel %vm304_vm7, %v826_v17, %v825_v21  ;;  %v831_v2 = vrot.slane %v1982_v20, 6 }
 0x3d8   :  { %v1986_v18 = vpop.eup %1985  ;;  %v828_v30 = vsel %vm307_vm8, %v1972_v10, %v827_v26  ;;  %v833_v32 = vrot.slane %v1984_v22, 5 }
 0x3d9   :  { %v830_v31 = vsel %vm310_vm9, %v829_v29, %v828_v30  ;;  %v835_v33 = vrot.slane %v1986_v18, 4 }
 0x3da   :  { %v832_v8 = vsel %vm313_vm10, %v831_v2, %v830_v31 }
 0x3db   :  { %v834_v35 = vsel %vm316_vm11, %v833_v32, %v832_v8 }
 0x3dc   :  { %v836_v36 = vsel %vm319_vm12, %v835_v33, %v834_v35 }
 0x3dd   :  { %v2501_v37 = vsel %vm814_vm5, %v836_v36, %v2433_v24  ;;  %v839_v46 = vsel %vm814_vm5, %v836_v36, 0.0 }
 0x3de   :  { %v841_v47 = vcombine.high %v839_v46, %v839_v46  ;;  %v848_v48 = vrot.slane %v839_v46, %v2283_v38  ;;  %v906_v49 = vpack.c.bf16 %v2501_v37, %v2501_v37 }
 0x3e0   :  { %v855_v51 = vrot.slane %v841_v47, %v2283_v38  ;;  %v856_v53 = vcombine.high %v848_v48, %v848_v48  ;;  %v864_v54 = vrot.slane %v848_v48, %v2283_v38  ;;  %1637 = vst.sshfl [vmem:[%s2790_s6 + $0x3] sm:$0x1 pattern:$0x73625140] %v848_v48  ;;  %1845 = vmatmul.mubr.bf16.vlgmr.msra.gmra.mrb[8].mxu1 %v906_v49  ;;  %v985_v47 = vpop.permute.xlu0 %984 }
 0x3e1   :  { %1869 = vmatpush3.bf16.msra.mxu1 %v2107_v1  ;;  %1884 = vmatprep.mubr.msk.bf16.mxu1 %vm2060_vm0, %v2059_v0  ;;  %vm986_vm13 = vcmp.eq.s32.totalorder %v985_v47, 1 }
 0x3e2   :  { %v857_v24 = vcombine.high %v855_v51, %v855_v51  ;;  %v871_v55 = vrot.slane %v855_v51, %v2283_v38  ;;  %v878_v56 = vrot.slane %v856_v53, %v2283_v38  ;;  %v886_v57 = vcombine.high %v864_v54, %v864_v54  ;;  %1638 = vst.sshfl [vmem:[%s2790_s6 + $0xb] sm:$0x1 pattern:$0x73625140] %v856_v53 }
 0x3e3   :  { %1639 = vst.sshfl [vmem:[%s2790_s6 + $0x23] sm:$0x1 pattern:$0x73625140] %v855_v51  ;;  %1870 = vmatprep.subr.bf16.mxu1 %v2059_v0 }
 0x3e4   :  { %v885_v1 = vrot.slane %v857_v24, %v2283_v38  ;;  %v887_v58 = vcombine.high %v871_v55, %v871_v55  ;;  %v888_v28 = vcombine.high %v878_v56, %v878_v56  ;;  %900 = vst [vmem:[%s2790_s6 + $0x13] sm:$0x1] %v886_v57  ;;  %1640 = vst.sshfl [vmem:[%s2790_s6 + $0x2b] sm:$0x1 pattern:$0x73625140] %v857_v24 }
 0x3e5   :  { %1871 = vmatpush3.bf16.msra.mxu1 %v2117_v3 }
 0x3e6   :  { %v889_v59 = vcombine.high %v885_v1, %v885_v1  ;;  %901 = vst [vmem:[%s2790_s6 + $0x1b] sm:$0x1] %v888_v28  ;;  %904 = vst [vmem:[%s2790_s6 + $0x33] sm:$0x1] %v887_v58  ;;  %1872 = vmatprep.subr.bf16.mxu1 %v2059_v0 }
 0x3e8   :  { %905 = vst [vmem:[%s2790_s6 + $0x3b] sm:$0x1] %v889_v59 }
 0x3e9   :  { %1873 = vmatpush3.bf16.msra.mxu1 %v2126_v5 }
 0x3ea   :  { %1874 = vmatprep.subr.bf16.mxu1 %v2059_v0 }
 0x3ed   :  { %1875 = vmatpush3.bf16.msra.mxu1 %v2154_v14 }
 0x3ee   :  { %1876 = vmatprep.subr.bf16.mxu1 %v2059_v0 }
 0x3f1   :  { %1877 = vmatpush3.bf16.msra.mxu1 %v2178_v19 }
 0x3f2   :  { %1878 = vmatprep.subr.bf16.mxu1 %v2059_v0 }
 0x3f5   :  { %1879 = vmatpush3.bf16.msra.mxu1 %v2190_v23 }
 0x3f6   :  { %1880 = vmatprep.subr.bf16.mxu1 %v2059_v0 }
 0x3f9   :  { %1881 = vmatpush3.bf16.msra.mxu1 %v2204_v25 }
 0x3fa   :  { %1882 = vmatprep.subr.bf16.mxu1 %v2059_v0 }
 0x3fd   :  { %1883 = vmatpush3.bf16.msra.mxu1 %v2214_v27 }
 0x4b3   :  { %v941_v3 = vpop.f32.mrb[8].mxu1 }
 0x4b4   :  { %v948_v5 = vrot.slane %v941_v3, 4  ;;  %v949_v60 = vrot.slane %v941_v3, 5  ;;  %v950_v14 = vrot.slane %v941_v3, 6  ;;  %v951_v61 = vrot.slane %v941_v3, 7  ;;  %v1846_v62 = vpop.f32.mrb[9].mxu1 }
 0x4b5   :  { %v952_v63 = vrot.slane %v941_v3, 1  ;;  %v953_v19 = vrot.slane %v941_v3, 2  ;;  %v967_v4 = vadd.f32 %v941_v3, %v2265_v44  ;;  %v944_v6 = vpop.f32.mrb[10].mxu1  ;;  %v954_v23 = vrot.slane %v941_v3, 3 }
 0x4b6   :  { %v963_v7 = vadd.f32 %v948_v5, %v2257_v40  ;;  %v964_v25 = vadd.f32 %v949_v60, %v2261_v42  ;;  %v965_v9 = vadd.f32 %v950_v14, %v2255_v39  ;;  %v1847_v10 = vpop.f32.mrb[11].mxu1  ;;  %v966_v27 = vadd.f32 %v951_v61, %v2259_v41  ;;  %v2052_v61 = vld [vmem:[%s2784_s3 + $0x8] sm:$0xff]  }
 0x4b7   :  { %1987 = vtanh.f32 %v967_v4  ;;  %v968_v11 = vadd.f32 %v952_v63, %v2267_v45  ;;  %v969_v12 = vadd.f32 %v953_v19, %v2263_v43  ;;  %v970_v13 = vadd.f32 %v954_v23, %v2270_v52  ;;  %v2053_v63 = vld [vmem:[%s2784_s3 + $0x10] sm:$0xff]   ;;  %v2054_v19 = vld [vmem:[%s2784_s3 + $0x18] sm:$0xff]   ;;  %v2055_v4 = vld [vmem:[%s2784_s3 + $0x20] sm:$0xff]  }
 0x4b8   :  { %1989 = vtanh.f32 %v963_v7  ;;  %v2056_v6 = vld [vmem:[%s2784_s3 + $0x28] sm:$0xff]   ;;  %v2057_v23 = vld [vmem:[%s2784_s3 + $0x30] sm:$0xff]   ;;  %v2058_v7 = vld [vmem:[%s2784_s3 + $0x38] sm:$0xff]  }
 0x4b9   :  { %1991 = vtanh.f32 %v964_v25 }
 0x4ba   :  { %1993 = vtanh.f32 %v965_v9 }
 0x4bb   :  { %1995 = vtanh.f32 %v966_v27 }
 0x4bc   :  { %1997 = vtanh.f32 %v968_v11 }
 0x4bd   :  { %1999 = vtanh.f32 %v969_v12 }
 0x4be   :  { %2001 = vtanh.f32 %v970_v13 }
 0x4c1   :  { %v1988_v15 = vpop.eup %1987 }
 0x4c2   :  { %v1990_v16 = vpop.eup %1989 }
 0x4c3   :  { %v1992_v50 = vpop.eup %1991  ;;  %v995_v17 = vrot.slane %v1990_v16, 4 }
 0x4c4   :  { %v1994_v20 = vpop.eup %1993  ;;  %v996_v21 = vrot.slane %v1992_v50, 3 }
 0x4c5   :  { %v1996_v22 = vpop.eup %1995  ;;  %v998_v26 = vrot.slane %v1994_v20, 2 }
 0x4c6   :  { %v1998_v29 = vpop.eup %1997  ;;  %v997_v18 = vsel %vm301_vm6, %v996_v21, %v995_v17  ;;  %v1000_v30 = vrot.slane %v1996_v22, 1 }
 0x4c7   :  { %v2000_v2 = vpop.eup %1999  ;;  %v999_v31 = vsel %vm304_vm7, %v998_v26, %v997_v18  ;;  %v1003_v33 = vrot.slane %v1998_v29, 7 }
 0x4c8   :  { %v2002_v32 = vpop.eup %2001  ;;  %v1001_v8 = vsel %vm307_vm8, %v1000_v30, %v999_v31  ;;  %v1005_v35 = vrot.slane %v2000_v2, 6 }
 0x4c9   :  { %v1002_v34 = vsel %vm310_vm9, %v1988_v15, %v1001_v8  ;;  %v1007_v46 = vrot.slane %v2002_v32, 5 }
 0x4ca   :  { %v1004_v36 = vsel %vm313_vm10, %v1003_v33, %v1002_v34 }
 0x4cb   :  { %v1006_v48 = vsel %vm316_vm11, %v1005_v35, %v1004_v36 }
 0x4cc   :  { %v1008_v49 = vsel %vm319_vm12, %v1007_v46, %v1006_v48 }
 0x4cd   :  { %v2568_v51 = vsel %vm986_vm13, %v1008_v49, %v2501_v37  ;;  %v1011_v53 = vsel %vm986_vm13, %v1008_v49, 0.0  ;;  %v2051_v37 = vld [vmem:[%s2784_s3] sm:$0xff]  }
 0x4ce   :  { %v1013_v54 = vcombine.high %v1011_v53, %v1011_v53  ;;  %v1020_v24 = vrot.slane %v1011_v53, %v2283_v38  ;;  %v1078_v55 = vpack.c.bf16 %v2568_v51, %v2568_v51 }
 0x4d0   :  { %v1027_v56 = vrot.slane %v1013_v54, %v2283_v38  ;;  %v1028_v57 = vcombine.high %v1020_v24, %v1020_v24  ;;  %v1036_v1 = vrot.slane %v1020_v24, %v2283_v38  ;;  %1642 = vst.sshfl [vmem:[%s2790_s6 + $0x4] sm:$0x1 pattern:$0x73625140] %v1020_v24  ;;  %1865 = vmatmul.mubr.bf16.vlgmr.msra.gmra.mrb[16].mxu0 %v1078_v55 }
 0x4d1   :  { %1889 = vmatpush3.bf16.msra.mxu0 %v2051_v37  ;;  %1904 = vmatprep.mubr.msk.bf16.mxu0 %vm2060_vm0, %v2059_v0 }
 0x4d2   :  { %v1029_v58 = vcombine.high %v1027_v56, %v1027_v56  ;;  %v1043_v28 = vrot.slane %v1027_v56, %v2283_v38  ;;  %v1050_v59 = vrot.slane %v1028_v57, %v2283_v38  ;;  %v1058_v3 = vcombine.high %v1036_v1, %v1036_v1  ;;  %1643 = vst.sshfl [vmem:[%s2790_s6 + $0xc] sm:$0x1 pattern:$0x73625140] %v1028_v57 }
 0x4d3   :  { %1644 = vst.sshfl [vmem:[%s2790_s6 + $0x24] sm:$0x1 pattern:$0x73625140] %v1027_v56  ;;  %1890 = vmatprep.subr.bf16.mxu0 %v2059_v0 }
 0x4d4   :  { %v1057_v5 = vrot.slane %v1029_v58, %v2283_v38  ;;  %v1059_v60 = vcombine.high %v1043_v28, %v1043_v28  ;;  %v1060_v14 = vcombine.high %v1050_v59, %v1050_v59  ;;  %1072 = vst [vmem:[%s2790_s6 + $0x14] sm:$0x1] %v1058_v3  ;;  %1645 = vst.sshfl [vmem:[%s2790_s6 + $0x2c] sm:$0x1 pattern:$0x73625140] %v1029_v58  ;;  %v1157_v58 = vpop.permute.xlu1 %1156 }
 0x4d5   :  { %1891 = vmatpush3.bf16.msra.mxu0 %v2052_v61  ;;  %vm1158_vm0 = vcmp.eq.s32.totalorder %v1157_v58, 1 }
 0x4d6   :  { %v1061_v62 = vcombine.high %v1057_v5, %v1057_v5  ;;  %1073 = vst [vmem:[%s2790_s6 + $0x1c] sm:$0x1] %v1060_v14  ;;  %1076 = vst [vmem:[%s2790_s6 + $0x34] sm:$0x1] %v1059_v60  ;;  %1892 = vmatprep.subr.bf16.mxu0 %v2059_v0 }
 0x4d8   :  { %1077 = vst [vmem:[%s2790_s6 + $0x3c] sm:$0x1] %v1061_v62 }
 0x4d9   :  { %1893 = vmatpush3.bf16.msra.mxu0 %v2053_v63 }
 0x4da   :  { %1894 = vmatprep.subr.bf16.mxu0 %v2059_v0 }
 0x4dd   :  { %1895 = vmatpush3.bf16.msra.mxu0 %v2054_v19 }
 0x4de   :  { %1896 = vmatprep.subr.bf16.mxu0 %v2059_v0 }
 0x4e1   :  { %1897 = vmatpush3.bf16.msra.mxu0 %v2055_v4 }
 0x4e2   :  { %1898 = vmatprep.subr.bf16.mxu0 %v2059_v0 }
 0x4e5   :  { %1899 = vmatpush3.bf16.msra.mxu0 %v2056_v6 }
 0x4e6   :  { %1900 = vmatprep.subr.bf16.mxu0 %v2059_v0 }
 0x4e9   :  { %1901 = vmatpush3.bf16.msra.mxu0 %v2057_v23 }
 0x4ea   :  { %1902 = vmatprep.subr.bf16.mxu0 %v2059_v0 }
 0x4ed   :  { %1903 = vmatpush3.bf16.msra.mxu0 %v2058_v7 }
 0x5a3   :  { %v1113_v25 = vpop.f32.mrb[16].mxu0 }
 0x5a4   :  { %v1120_v9 = vrot.slane %v1113_v25, 3  ;;  %v1121_v10 = vrot.slane %v1113_v25, 4  ;;  %v1122_v27 = vrot.slane %v1113_v25, 5  ;;  %v1123_v11 = vrot.slane %v1113_v25, 6  ;;  %v1866_v12 = vpop.f32.mrb[17].mxu0 }
 0x5a5   :  { %v1124_v13 = vrot.slane %v1113_v25, 7  ;;  %v1125_v15 = vrot.slane %v1113_v25, 1  ;;  %v1116_v16 = vpop.f32.mrb[18].mxu0  ;;  %v1126_v50 = vrot.slane %v1113_v25, 2  ;;  %v1140_v30 = vadd.f32 %v1113_v25, %v2267_v45 }
 0x5a6   :  { %v1135_v17 = vadd.f32 %v1120_v9, %v2257_v40  ;;  %v1136_v20 = vadd.f32 %v1121_v10, %v2261_v42  ;;  %v1137_v0 = vadd.f32 %v1122_v27, %v2255_v39  ;;  %v1867_v21 = vpop.f32.mrb[19].mxu0  ;;  %v1138_v22 = vadd.f32 %v1123_v11, %v2259_v41 }
 0x5a7   :  { %v1139_v26 = vadd.f32 %v1124_v13, %v2265_v44  ;;  %v1141_v29 = vadd.f32 %v1125_v15, %v2263_v43  ;;  %v1142_v18 = vadd.f32 %v1126_v50, %v2270_v52 }
 0x5a8   :  { %2003 = vtanh.f32 %v1135_v17 }
 0x5a9   :  { %2005 = vtanh.f32 %v1136_v20 }
 0x5aa   :  { %2007 = vtanh.f32 %v1137_v0 }
 0x5ab   :  { %2009 = vtanh.f32 %v1138_v22 }
 0x5ac   :  { %2011 = vtanh.f32 %v1139_v26 }
 0x5ad   :  { %2013 = vtanh.f32 %v1141_v29 }
 0x5ae   :  { %2015 = vtanh.f32 %v1142_v18 }
 0x5af   :  { %2017 = vtanh.f32 %v1140_v30 }
 0x5b2   :  { %v2004_v2 = vpop.eup %2003 }
 0x5b3   :  { %v2006_v31 = vpop.eup %2005  ;;  %v1167_v32 = vrot.slane %v2004_v2, 5 }
 0x5b4   :  { %v2008_v8 = vpop.eup %2007  ;;  %v1168_v33 = vrot.slane %v2006_v31, 4 }
 0x5b5   :  { %v2010_v34 = vpop.eup %2009  ;;  %v1170_v35 = vrot.slane %v2008_v8, 3 }
 0x5b6   :  { %v2012_v36 = vpop.eup %2011  ;;  %v1169_v46 = vsel %vm301_vm6, %v1168_v33, %v1167_v32  ;;  %v1172_v47 = vrot.slane %v2010_v34, 2 }
 0x5b7   :  { %v2014_v48 = vpop.eup %2013  ;;  %v1171_v49 = vsel %vm304_vm7, %v1170_v35, %v1169_v46  ;;  %v1174_v53 = vrot.slane %v2012_v36, 1 }
 0x5b8   :  { %v2016_v54 = vpop.eup %2015  ;;  %v1173_v24 = vsel %vm307_vm8, %v1172_v47, %v1171_v49  ;;  %v1177_v57 = vrot.slane %v2014_v48, 7 }
 0x5b9   :  { %v2018_v55 = vpop.eup %2017  ;;  %v1175_v56 = vsel %vm310_vm9, %v1174_v53, %v1173_v24  ;;  %v1179_v37 = vrot.slane %v2016_v54, 6 }
 0x5ba   :  { %v1176_v1 = vsel %vm313_vm10, %v2018_v55, %v1175_v56 }
 0x5bb   :  { %v1178_v28 = vsel %vm316_vm11, %v1177_v57, %v1176_v1 }
 0x5bc   :  { %v1180_v59 = vsel %vm319_vm12, %v1179_v37, %v1178_v28  ;;  %v1329_v37 = vpop.permute.xlu0 %1328 }
 0x5bd   :  { %v2651_v3 = vsel %vm1158_vm0, %v1180_v59, %v2568_v51  ;;  %v1183_v5 = vsel %vm1158_vm0, %v1180_v59, 0.0  ;;  %vm1330_vm14 = vcmp.eq.s32.totalorder %v1329_v37, 1 }
 0x5be   :  { %v1185_v60 = vcombine.high %v1183_v5, %v1183_v5  ;;  %v1192_v14 = vrot.slane %v1183_v5, %v2283_v38  ;;  %v1250_v61 = vpack.c.bf16 %v2651_v3, %v2651_v3 }
 0x5c0   :  { %v1199_v62 = vrot.slane %v1185_v60, %v2283_v38  ;;  %v1200_v63 = vcombine.high %v1192_v14, %v1192_v14  ;;  %v1208_v19 = vrot.slane %v1192_v14, %v2283_v38  ;;  %1647 = vst.sshfl [vmem:[%s2790_s6 + $0x5] sm:$0x1 pattern:$0x73625140] %v1192_v14  ;;  %1885 = vmatmul.mubr.bf16.vlgmr.msra.gmra.mrb[12].mxu1 %v1250_v61 }
 0x5c2   :  { %v1201_v4 = vcombine.high %v1199_v62, %v1199_v62  ;;  %v1215_v51 = vrot.slane %v1199_v62, %v2283_v38  ;;  %v1222_v6 = vrot.slane %v1200_v63, %v2283_v38  ;;  %v1230_v23 = vcombine.high %v1208_v19, %v1208_v19  ;;  %1648 = vst.sshfl [vmem:[%s2790_s6 + $0xd] sm:$0x1 pattern:$0x73625140] %v1200_v63 }
 0x5c3   :  { %1649 = vst.sshfl [vmem:[%s2790_s6 + $0x25] sm:$0x1 pattern:$0x73625140] %v1199_v62 }
 0x5c4   :  { %v1229_v7 = vrot.slane %v1201_v4, %v2283_v38  ;;  %v1231_v25 = vcombine.high %v1215_v51, %v1215_v51  ;;  %v1232_v9 = vcombine.high %v1222_v6, %v1222_v6  ;;  %1244 = vst [vmem:[%s2790_s6 + $0x15] sm:$0x1] %v1230_v23  ;;  %1650 = vst.sshfl [vmem:[%s2790_s6 + $0x2d] sm:$0x1 pattern:$0x73625140] %v1201_v4 }
 0x5c6   :  { %v1233_v10 = vcombine.high %v1229_v7, %v1229_v7  ;;  %1245 = vst [vmem:[%s2790_s6 + $0x1d] sm:$0x1] %v1232_v9  ;;  %1248 = vst [vmem:[%s2790_s6 + $0x35] sm:$0x1] %v1231_v25 }
 0x5c8   :  { %1249 = vst [vmem:[%s2790_s6 + $0x3d] sm:$0x1] %v1233_v10 }
 0x693   :  { %v1285_v27 = vpop.f32.mrb[12].mxu1 }
 0x694   :  { %v1292_v11 = vrot.slane %v1285_v27, 2  ;;  %v1293_v12 = vrot.slane %v1285_v27, 3  ;;  %v1294_v13 = vrot.slane %v1285_v27, 4  ;;  %v1295_v15 = vrot.slane %v1285_v27, 5  ;;  %v1886_v16 = vpop.f32.mrb[13].mxu1 }
 0x695   :  { %v1296_v50 = vrot.slane %v1285_v27, 6  ;;  %v1297_v17 = vrot.slane %v1285_v27, 7  ;;  %v1288_v20 = vpop.f32.mrb[14].mxu1  ;;  %v1298_v0 = vrot.slane %v1285_v27, 1  ;;  %v1313_v32 = vadd.f32 %v1285_v27, %v2263_v43 }
 0x696   :  { %v1307_v21 = vadd.f32 %v1292_v11, %v2257_v40  ;;  %v1308_v22 = vadd.f32 %v1293_v12, %v2261_v42  ;;  %v1309_v26 = vadd.f32 %v1294_v13, %v2255_v39  ;;  %v1887_v29 = vpop.f32.mrb[15].mxu1  ;;  %v1310_v18 = vadd.f32 %v1295_v15, %v2259_v41 }
 0x697   :  { %v1311_v30 = vadd.f32 %v1296_v50, %v2265_v44  ;;  %v1312_v2 = vadd.f32 %v1297_v17, %v2267_v45  ;;  %v1314_v31 = vadd.f32 %v1298_v0, %v2270_v52 }
 0x698   :  { %2019 = vtanh.f32 %v1307_v21 }
 0x699   :  { %2021 = vtanh.f32 %v1308_v22 }
 0x69a   :  { %2023 = vtanh.f32 %v1309_v26 }
 0x69b   :  { %2025 = vtanh.f32 %v1310_v18 }
 0x69c   :  { %2027 = vtanh.f32 %v1311_v30 }
 0x69d   :  { %2029 = vtanh.f32 %v1312_v2 }
 0x69e   :  { %2031 = vtanh.f32 %v1314_v31 }
 0x69f   :  { %2033 = vtanh.f32 %v1313_v32 }
 0x6a2   :  { %v2020_v8 = vpop.eup %2019 }
 0x6a3   :  { %v2022_v33 = vpop.eup %2021  ;;  %v1339_v34 = vrot.slane %v2020_v8, 6 }
 0x6a4   :  { %v2024_v35 = vpop.eup %2023  ;;  %v1340_v36 = vrot.slane %v2022_v33, 5 }
 0x6a5   :  { %v2026_v46 = vpop.eup %2025  ;;  %v1342_v47 = vrot.slane %v2024_v35, 4 }
 0x6a6   :  { %v2028_v48 = vpop.eup %2027  ;;  %v1341_v49 = vsel %vm301_vm6, %v1340_v36, %v1339_v34  ;;  %v1344_v53 = vrot.slane %v2026_v46, 3 }
 0x6a7   :  { %v2030_v54 = vpop.eup %2029  ;;  %v1343_v24 = vsel %vm304_vm7, %v1342_v47, %v1341_v49  ;;  %v1346_v55 = vrot.slane %v2028_v48, 2 }
 0x6a8   :  { %v2032_v56 = vpop.eup %2031  ;;  %v1345_v57 = vsel %vm307_vm8, %v1344_v53, %v1343_v24  ;;  %v1348_v1 = vrot.slane %v2030_v54, 1  ;;  %v1501_v24 = vpop.permute.xlu1 %1500 }
 0x6a9   :  { %v1347_v58 = vsel %vm310_vm9, %v1346_v55, %v1345_v57  ;;  %v2034_v28 = vpop.eup %2033  ;;  %v1351_v5 = vrot.slane %v2032_v56, 7  ;;  %vm1502_vm15 = vcmp.eq.s32.totalorder %v1501_v24, 1 }
 0x6aa   :  { %v1349_v59 = vsel %vm313_vm10, %v1348_v1, %v1347_v58 }
 0x6ab   :  { %v1350_v60 = vsel %vm316_vm11, %v2034_v28, %v1349_v59 }
 0x6ac   :  { %v1352_v14 = vsel %vm319_vm12, %v1351_v5, %v1350_v60 }
 0x6ad   :  { %v2701_v61 = vsel %vm1330_vm14, %v1352_v14, %v2651_v3  ;;  %v1355_v62 = vsel %vm1330_vm14, %v1352_v14, 0.0 }
 0x6ae   :  { %v1357_v63 = vcombine.high %v1355_v62, %v1355_v62  ;;  %v1364_v19 = vrot.slane %v1355_v62, %v2283_v38  ;;  %v1422_v4 = vpack.c.bf16 %v2701_v61, %v2701_v61 }
 0x6b0   :  { %v1371_v51 = vrot.slane %v1357_v63, %v2283_v38  ;;  %v1372_v6 = vcombine.high %v1364_v19, %v1364_v19  ;;  %v1380_v23 = vrot.slane %v1364_v19, %v2283_v38  ;;  %1652 = vst.sshfl [vmem:[%s2790_s6 + $0x6] sm:$0x1 pattern:$0x73625140] %v1364_v19  ;;  %1905 = vmatmul.mubr.bf16.vlgmr.msra.gmra.mrb[20].mxu0 %v1422_v4 }
 0x6b2   :  { %v1373_v7 = vcombine.high %v1371_v51, %v1371_v51  ;;  %v1387_v3 = vrot.slane %v1371_v51, %v2283_v38  ;;  %v1394_v25 = vrot.slane %v1372_v6, %v2283_v38  ;;  %v1402_v9 = vcombine.high %v1380_v23, %v1380_v23  ;;  %1653 = vst.sshfl [vmem:[%s2790_s6 + $0xe] sm:$0x1 pattern:$0x73625140] %v1372_v6 }
 0x6b3   :  { %1654 = vst.sshfl [vmem:[%s2790_s6 + $0x26] sm:$0x1 pattern:$0x73625140] %v1371_v51 }
 0x6b4   :  { %v1401_v10 = vrot.slane %v1373_v7, %v2283_v38  ;;  %v1403_v27 = vcombine.high %v1387_v3, %v1387_v3  ;;  %v1404_v11 = vcombine.high %v1394_v25, %v1394_v25  ;;  %1416 = vst [vmem:[%s2790_s6 + $0x16] sm:$0x1] %v1402_v9  ;;  %1655 = vst.sshfl [vmem:[%s2790_s6 + $0x2e] sm:$0x1 pattern:$0x73625140] %v1373_v7 }
 0x6b6   :  { %v1405_v12 = vcombine.high %v1401_v10, %v1401_v10  ;;  %1417 = vst [vmem:[%s2790_s6 + $0x1e] sm:$0x1] %v1404_v11  ;;  %1420 = vst [vmem:[%s2790_s6 + $0x36] sm:$0x1] %v1403_v27 }
 0x6b8   :  { %1421 = vst [vmem:[%s2790_s6 + $0x3e] sm:$0x1] %v1405_v12 }
 0x783   :  { %v1457_v13 = vpop.f32.mrb[20].mxu0 }
 0x784   :  { %v1464_v15 = vrot.slane %v1457_v13, 1  ;;  %v1465_v16 = vrot.slane %v1457_v13, 2  ;;  %v1466_v50 = vrot.slane %v1457_v13, 3  ;;  %v1467_v17 = vrot.slane %v1457_v13, 4  ;;  %v1906_v20 = vpop.f32.mrb[21].mxu0 }
 0x785   :  { %v1468_v0 = vrot.slane %v1457_v13, 5  ;;  %v1469_v21 = vrot.slane %v1457_v13, 6  ;;  %v1460_v22 = vpop.f32.mrb[22].mxu0  ;;  %v1470_v26 = vrot.slane %v1457_v13, 7 }
 0x786   :  { %v1479_v29 = vadd.f32 %v1464_v15, %v2257_v40  ;;  %v1480_v18 = vadd.f32 %v1465_v16, %v2261_v42  ;;  %v1481_v30 = vadd.f32 %v1466_v50, %v2255_v39  ;;  %v1907_v2 = vpop.f32.mrb[23].mxu0  ;;  %v1482_v31 = vadd.f32 %v1467_v17, %v2259_v41 }
 0x787   :  { %v1483_v32 = vadd.f32 %v1468_v0, %v2265_v44  ;;  %v1484_v8 = vadd.f32 %v1469_v21, %v2267_v45  ;;  %v1485_v33 = vadd.f32 %v1470_v26, %v2263_v43  ;;  %v1486_v40 = vadd.f32 %v1457_v13, %v2270_v52 }
 0x788   :  { %2035 = vtanh.f32 %v1479_v29 }
 0x789   :  { %2037 = vtanh.f32 %v1480_v18 }
 0x78a   :  { %2039 = vtanh.f32 %v1481_v30 }
 0x78b   :  { %2041 = vtanh.f32 %v1482_v31 }
 0x78c   :  { %2043 = vtanh.f32 %v1483_v32 }
 0x78d   :  { %2045 = vtanh.f32 %v1484_v8 }
 0x78e   :  { %2047 = vtanh.f32 %v1485_v33 }
 0x78f   :  { %2049 = vtanh.f32 %v1486_v40 }
 0x792   :  { %v2036_v39 = vpop.eup %2035 }
 0x793   :  { %v2038_v42 = vpop.eup %2037  ;;  %v1511_v34 = vrot.slane %v2036_v39, 7 }
 0x794   :  { %v2040_v41 = vpop.eup %2039  ;;  %v1512_v35 = vrot.slane %v2038_v42, 6 }
 0x795   :  { %v2042_v44 = vpop.eup %2041  ;;  %v1514_v36 = vrot.slane %v2040_v41, 5 }
 0x796   :  { %v2044_v46 = vpop.eup %2043  ;;  %v1513_v45 = vsel %vm301_vm6, %v1512_v35, %v1511_v34  ;;  %v1516_v47 = vrot.slane %v2042_v44, 4 }
 0x797   :  { %v2046_v43 = vpop.eup %2045  ;;  %v1515_v48 = vsel %vm304_vm7, %v1514_v36, %v1513_v45  ;;  %v1518_v49 = vrot.slane %v2044_v46, 3 }
 0x798   :  { %v2048_v53 = vpop.eup %2047  ;;  %v1517_v52 = vsel %vm307_vm8, %v1516_v47, %v1515_v48  ;;  %v1520_v54 = vrot.slane %v2046_v43, 2 }
 0x799   :  { %v1519_v55 = vsel %vm310_vm9, %v1518_v49, %v1517_v52  ;;  %v1522_v56 = vrot.slane %v2048_v53, 1  ;;  %v2050_v1 = vpop.eup %2049 }
 0x79a   :  { %v1521_v57 = vsel %vm313_vm10, %v1520_v54, %v1519_v55 }
 0x79b   :  { %v1523_v37 = vsel %vm316_vm11, %v1522_v56, %v1521_v57 }
 0x79c   :  { %v1524_v58 = vsel %vm319_vm12, %v2050_v1, %v1523_v37 }
 0x79d   :  { %v1526_v28 = vsel %vm1502_vm15, %v1524_v58, %v2701_v61  ;;  %v1527_v59 = vsel %vm1502_vm15, %v1524_v58, 0.0 }
 0x79e   :  { %v1529_v5 = vcombine.high %v1527_v59, %v1527_v59  ;;  %v1536_v60 = vrot.slane %v1527_v59, %v2283_v38  ;;  %1598 = vst [vmem:[%s2791_s7] sm:$0xff] %v1526_v28 }
 0x7a0   :  { %v1543_v14 = vrot.slane %v1529_v5, %v2283_v38  ;;  %v1544_v62 = vcombine.high %v1536_v60, %v1536_v60  ;;  %v1552_v63 = vrot.slane %v1536_v60, %v2283_v38  ;;  %1657 = vst.sshfl [vmem:[%s2790_s6 + $0x7] sm:$0x1 pattern:$0x73625140] %v1536_v60 }
 0x7a2   :  { %v1545_v19 = vcombine.high %v1543_v14, %v1543_v14  ;;  %v1559_v61 = vrot.slane %v1543_v14, %v2283_v38  ;;  %v1566_v4 = vrot.slane %v1544_v62, %v2283_v38  ;;  %v1574_v51 = vcombine.high %v1552_v63, %v1552_v63  ;;  %1658 = vst.sshfl [vmem:[%s2790_s6 + $0xf] sm:$0x1 pattern:$0x73625140] %v1544_v62 }
 0x7a3   :  { %1659 = vst.sshfl [vmem:[%s2790_s6 + $0x27] sm:$0x1 pattern:$0x73625140] %v1543_v14 }
 0x7a4   :  { %v1573_v6 = vrot.slane %v1545_v19, %v2283_v38  ;;  %v1575_v23 = vcombine.high %v1559_v61, %v1559_v61  ;;  %v1576_v7 = vcombine.high %v1566_v4, %v1566_v4  ;;  %1588 = vst [vmem:[%s2790_s6 + $0x17] sm:$0x1] %v1574_v51  ;;  %1660 = vst.sshfl [vmem:[%s2790_s6 + $0x2f] sm:$0x1 pattern:$0x73625140] %v1545_v19 }
 0x7a6   :  { %v1577_v3 = vcombine.high %v1573_v6, %v1573_v6  ;;  %1589 = vst [vmem:[%s2790_s6 + $0x1f] sm:$0x1] %v1576_v7  ;;  %1592 = vst [vmem:[%s2790_s6 + $0x37] sm:$0x1] %v1575_v23 }
 0x7a8   :  { %1593 = vst [vmem:[%s2790_s6 + $0x3f] sm:$0x1] %v1577_v3 }

</bundles_post_ra>
